<compile_context>
chip_gen: v7x
topology: tpu7x:2x2x1
jax: 0.10.0
libtpu: 0.0.40
codegen_flags: <defaults>
</compile_context>

<pallas_src>
import functools
import math

import jax
import jax.numpy as jnp
from jax.experimental import pallas as pl
from jax.experimental.pallas import tpu as pltpu


_INV_SQRT2 = 1.0 / math.sqrt(2.0)


def _gelu_exact(v):
    # PyTorch nn.GELU() default = exact (erf-based) GELU, computed in f32.
    return 0.5 * v * (1.0 + jax.lax.erf(v * _INV_SQRT2))


def _round_up(x, m):
    return ((x + m - 1) // m) * m


def _choose_tile(dim, target, align):
    """Largest tile (multiple of `align`, <= target) that divides the
    align-padded dim; falls back to padding only if no divisor >= target/2
    exists.  Returns (tile, padded_dim)."""
    dim_al = _round_up(max(dim, align), align)
    t_max = min(_round_up(target, align), dim_al)
    cand = t_max
    while cand >= max(align, t_max // 2):
        if dim_al % cand == 0:
            return cand, dim_al
        cand -= align
    return t_max, _round_up(dim_al, t_max)


def _hidden_chunk(hidden):
    """Slab width for staging the hidden-layer activations."""
    for c in (512, 384, 256, 128):
        if hidden >= c and hidden % c == 0:
            return c
    return hidden


def _vmem_limit_bytes():
    """Generation-aware scoped-VMEM limit."""
    cap = 64 * 1024 * 1024
    try:
        cap = int(pltpu.get_tpu_info().vmem_capacity_bytes)
    except Exception:
        pass
    if cap >= 96 * 1024 * 1024:       # v5e / v6e: 128 MiB physical
        return 100 * 1024 * 1024
    return 44 * 1024 * 1024           # v7x: 64 MiB per TC, leave headroom


def _resident_spec(block_shape):
    """BlockSpec for a grid-invariant operand, single-buffered when the
    pipeline_mode / pl.Buffered API is available (halves resident VMEM)."""
    idx = lambda i, j: (0, 0)
    try:
        return pl.BlockSpec(block_shape, idx, pipeline_mode=pl.Buffered(1))
    except (AttributeError, TypeError):
        return pl.BlockSpec(block_shape, idx)


def proj_head_kernel(x_ref, w1_ref, b1_ref, w2_ref, b2_ref, w3_ref, b3_ref,
                     wl_ref, o_ref, h1_ref, h2_ref, z_ref, *, hidden_chunk):
    # grid = (batch_tiles, out_col_tiles).  Axis 1 MUST stay "arbitrary"
    # (innermost, j==0 runs first for every i) because z_ref is computed at
    # j==0 and reused by the later j steps of the same batch tile.
    hidden = h1_ref.shape[1]

    @pl.when(pl.program_id(1) == 0)
    def _():
        xb = x_ref[...]                               # bf16 (tb, in_dim)

        # Layer 1 + GELU, staged into bf16 scratch in static hidden-column
        # slabs so the f32 intermediate live range stays (tb, hidden_chunk).
        for c0 in range(0, hidden, hidden_chunk):
            sl = slice(c0, c0 + hidden_chunk)
            h = jnp.dot(xb, w1_ref[:, sl], preferred_element_type=jnp.float32)
            h1_ref[:, sl] = _gelu_exact(h + b1_ref[:, sl]).astype(h1_ref.dtype)

        # Layer 2 + GELU (reads all of h1, writes h2 slab by slab).
        for c0 in range(0, hidden, hidden_chunk):
            sl = slice(c0, c0 + hidden_chunk)
            h = jnp.dot(h1_ref[...], w2_ref[:, sl],
                        preferred_element_type=jnp.float32)
            h2_ref[:, sl] = _gelu_exact(h + b2_ref[:, sl]).astype(h2_ref.dtype)

        # Layer 3 -> bottleneck, then F.normalize(z, dim=-1, p=2):
        # z / max(||z||, 1e-12) == z * rsqrt(max(||z||^2, 1e-24))  (EUP rsqrt).
        z = jnp.dot(h2_ref[...], w3_ref[...],
                    preferred_element_type=jnp.float32) + b3_ref[...]
        ss = jnp.sum(z * z, axis=-1, keepdims=True)
        z_ref[...] = (z * jax.lax.rsqrt(jnp.maximum(ss, 1e-24))).astype(z_ref.dtype)

    # Weight-normalized last layer (g == 1, bias=False); wl columns were
    # unit-normalized in the wrapper.  One lane-dense output column tile per j.
    o_ref[...] = jnp.dot(z_ref[...], wl_ref[...],
                         preferred_element_type=jnp.float32).astype(o_ref.dtype)


def proj_head(x, params, *, tb=256, tn=1024):
    """x: [B, in_dim] float32.  params: weights in (fan_in, fan_out) layout."""
    B, in_dim = x.shape
    w1, b1 = params["w1"], params["b1"]
    w2, b2 = params["w2"], params["b2"]
    w3, b3 = params["w3"], params["b3"]
    wl_v = params["wl_v"]
    hidden = w1.shape[1]
    bottleneck = w3.shape[1]
    out_dim = wl_v.shape[1]

    # weight_norm last layer: W_eff = g * v / ||v|| (norm over fan_in, g = 1),
    # fused with the bf16 cast so the big (bottleneck, out_dim) tensor gets
    # only one extra read+write pass.
    # TODO(synk): cache the normalized bf16 wl across calls when the weights
    # are static (inference) instead of recomputing per forward.
    sumsq = jnp.sum(jnp.square(wl_v), axis=0, keepdims=True)
    wlb = (wl_v * jax.lax.rsqrt(jnp.maximum(sumsq, 1e-24))).astype(jnp.bfloat16)

    # bf16 matmul operands, f32 MXU accumulation inside the kernel.
    xb = x.astype(jnp.bfloat16)
    w1b = w1.astype(jnp.bfloat16)
    w2b = w2.astype(jnp.bfloat16)
    w3b = w3.astype(jnp.bfloat16)

    # --- tile selection ------------------------------------------------------
    # Batch tiles: keep >= 2 tiles when B allows so the "parallel" i axis can
    # shard across both v7x TensorCores, while keeping M >= 128 for the MXU.
    tb_target = tb
    if B >= 256:
        tb_target = min(tb, max(128, _round_up(_round_up(B, 8) // 2, 8)))
    tb_eff, B_pad = _choose_tile(B, tb_target, 8)
    # Output-column tiles: large (fewer ~0.35us grid steps), lane-dense, and
    # preferring a divisor of out_dim so wl needs no padded copy.
    tn_eff, N_pad = _choose_tile(out_dim, tn, 128)

    if B_pad != B:
        xb = jnp.pad(xb, ((0, B_pad - B), (0, 0)))
    if N_pad != out_dim:
        wlb = jnp.pad(wlb, ((0, 0), (0, N_pad - out_dim)))

    grid = (B_pad // tb_eff, N_pad // tn_eff)

    in_specs = [
        pl.BlockSpec((tb_eff, in_dim), lambda i, j: (i, 0)),   # x (per batch tile)
        _resident_spec((in_dim, hidden)),                      # w1 (resident)
        _resident_spec((1, hidden)),                           # b1
        _resident_spec((hidden, hidden)),                      # w2
        _resident_spec((1, hidden)),                           # b2
        _resident_spec((hidden, bottleneck)),                  # w3
        _resident_spec((1, bottleneck)),                       # b3
        pl.BlockSpec((bottleneck, tn_eff), lambda i, j: (0, j)),  # wl column tile
    ]
    out_specs = pl.BlockSpec((tb_eff, tn_eff), lambda i, j: (i, j))

    kernel = functools.partial(proj_head_kernel,
                               hidden_chunk=_hidden_chunk(hidden))

    out = pl.pallas_call(
        kernel,
        out_shape=jax.ShapeDtypeStruct((B_pad, N_pad), x.dtype),
        grid_spec=pltpu.PrefetchScalarGridSpec(
            num_scalar_prefetch=0,
            grid=grid,
            in_specs=in_specs,
            out_specs=out_specs,
            scratch_shapes=[
                pltpu.VMEM((tb_eff, hidden), jnp.bfloat16),      # h1 (post-GELU)
                pltpu.VMEM((tb_eff, hidden), jnp.bfloat16),      # h2 (post-GELU)
                pltpu.VMEM((tb_eff, bottleneck), jnp.bfloat16),  # z (normalized)
            ],
        ),
        compiler_params=pltpu.CompilerParams(
            # Axis 1 must remain "arbitrary": the z scratch reuse relies on
            # j==0 executing first for each batch tile i.
            dimension_semantics=("parallel", "arbitrary"),
            vmem_limit_bytes=_vmem_limit_bytes(),
        ),
    )(xb, w1b, b1, w2b, b2, w3b, b3, wlb)

    return out[:B, :out_dim]


def make_params(key, in_dim, out_dim, mlp_ratio=2, bottleneck_ratio=0.5):
    hidden_dim = round(in_dim * mlp_ratio)
    bottleneck_dim = round(in_dim * bottleneck_ratio)
    k1, k2, k3, k4 = jax.random.split(key, 4)
    std = 0.02  # trunc_normal_(std=0.02); deterministic synthetic init
    return {
        "w1": jax.random.normal(k1, (in_dim, hidden_dim), jnp.float32) * std,
        "b1": jnp.zeros((1, hidden_dim), jnp.float32),
        "w2": jax.random.normal(k2, (hidden_dim, hidden_dim), jnp.float32) * std,
        "b2": jnp.zeros((1, hidden_dim), jnp.float32),
        "w3": jax.random.normal(k3, (hidden_dim, bottleneck_dim), jnp.float32) * std,
        "b3": jnp.zeros((1, bottleneck_dim), jnp.float32),
        # weight_norm "v" parameter of the last layer (bias=False, g fixed to 1)
        "wl_v": jax.random.normal(k4, (bottleneck_dim, out_dim), jnp.float32),
    }


def proj_head_ref(x, params):
    """Pure-JAX reference matching the PyTorch forward, with the same bf16
    operand / f32 accumulation policy as the kernel."""
    bf = jnp.bfloat16
    w1, w2, w3 = (params[k].astype(bf) for k in ("w1", "w2", "w3"))
    h = jnp.dot(x.astype(bf), w1, preferred_element_type=jnp.float32) + params["b1"]
    h = _gelu_exact(h)
    h = jnp.dot(h.astype(bf), w2, preferred_element_type=jnp.float32) + params["b2"]
    h = _gelu_exact(h)
    z = jnp.dot(h.astype(bf), w3, preferred_element_type=jnp.float32) + params["b3"]
    z = z * jax.lax.rsqrt(jnp.maximum(jnp.sum(z * z, -1, keepdims=True), 1e-24))
    sumsq = jnp.sum(jnp.square(params["wl_v"]), axis=0, keepdims=True)
    wl = (params["wl_v"] * jax.lax.rsqrt(jnp.maximum(sumsq, 1e-24))).astype(bf)
    return jnp.dot(z.astype(bf), wl, preferred_element_type=jnp.float32)


if __name__ == "__main__":
    # Lane-aligned small config: in=128 -> hidden=256, bottleneck=64; out=512.
    in_dim, out_dim, B = 128, 512, 256
    key = jax.random.PRNGKey(0)
    kx, kp = jax.random.split(key)
    x = jax.random.normal(kx, (B, in_dim), jnp.float32)
    params = make_params(kp, in_dim, out_dim)

    out = jax.block_until_ready(proj_head(x, params))
    ref = proj_head_ref(x, params)

    assert out.shape == (B, out_dim), out.shape
    max_err = float(jnp.max(jnp.abs(out - ref)))
    assert jnp.allclose(out, ref, rtol=2e-2, atol=2e-2), f"mismatch: {max_err}"
    print("KERNEL_OK")
</pallas_src>

<mosaic_0001>
module attributes {stable_mosaic.version = 11 : i64} {
  func.func @proj_head_kernel(%arg0: i32, %arg1: i32, %arg2: memref<128x128xbf16, #tpu.memory_space<vmem>>, %arg3: memref<128x256xbf16, #tpu.memory_space<vmem>>, %arg4: memref<1x256xf32, #tpu.memory_space<vmem>>, %arg5: memref<256x256xbf16, #tpu.memory_space<vmem>>, %arg6: memref<1x256xf32, #tpu.memory_space<vmem>>, %arg7: memref<256x64xbf16, #tpu.memory_space<vmem>>, %arg8: memref<1x64xf32, #tpu.memory_space<vmem>>, %arg9: memref<64x512xbf16, #tpu.memory_space<vmem>>, %arg10: memref<128x512xf32, #tpu.memory_space<vmem>>, %arg11: memref<128x256xbf16, #tpu.memory_space<vmem>>, %arg12: memref<128x256xbf16, #tpu.memory_space<vmem>>, %arg13: memref<128x64xbf16, #tpu.memory_space<vmem>>) attributes {dimension_semantics = [#tpu.dimension_semantics<parallel>, #tpu.dimension_semantics<arbitrary>], iteration_bounds = array<i64: 2, 1>, scalar_prefetch = 0 : i64, scratch_operands = 3 : i64, tpu.core_type = #tpu.core_type<tc>, window_params = [{transform_indices = @transform_0, window_bounds = array<i64: 128, 128>}, {pipeline_mode = #tpu.pipeline_mode<synchronous>, transform_indices = @transform_1, window_bounds = array<i64: 128, 256>}, {pipeline_mode = #tpu.pipeline_mode<synchronous>, transform_indices = @transform_2, window_bounds = array<i64: 1, 256>}, {pipeline_mode = #tpu.pipeline_mode<synchronous>, transform_indices = @transform_3, window_bounds = array<i64: 256, 256>}, {pipeline_mode = #tpu.pipeline_mode<synchronous>, transform_indices = @transform_4, window_bounds = array<i64: 1, 256>}, {pipeline_mode = #tpu.pipeline_mode<synchronous>, transform_indices = @transform_5, window_bounds = array<i64: 256, 64>}, {pipeline_mode = #tpu.pipeline_mode<synchronous>, transform_indices = @transform_6, window_bounds = array<i64: 1, 64>}, {transform_indices = @transform_7, window_bounds = array<i64: 64, 512>}, {transform_indices = @transform_8, window_bounds = array<i64: 128, 512>}]} {
    %c0_i32 = arith.constant 0 : i32
    %0 = arith.cmpi eq, %arg1, %c0_i32 : i32
    %1 = arith.extui %0 : i1 to i32
    %c0_i32_0 = arith.constant 0 : i32
    %2 = arith.cmpi ne, %1, %c0_i32_0 : i32
    scf.if %2 {
      %c0_6 = arith.constant 0 : index
      %c0_7 = arith.constant 0 : index
      %7 = vector.load %arg2[%c0_6, %c0_7] : memref<128x128xbf16, #tpu.memory_space<vmem>>, vector<128x128xbf16>
      %c0_8 = arith.constant 0 : index
      %c0_9 = arith.constant 0 : index
      %8 = vector.load %arg3[%c0_8, %c0_9] : memref<128x256xbf16, #tpu.memory_space<vmem>>, vector<128x256xbf16>
      %cst_10 = arith.constant dense<0.000000e+00> : vector<128x256xf32>
      %9 = tpu.matmul %7, %8, %cst_10 {dimension_numbers = #tpu.dot_dimension_numbers<[1], [0], [0], [1], [0, 0, 1, 1], [], []>} : vector<128x128xbf16>, vector<128x256xbf16>, vector<128x256xf32> -> vector<128x256xf32>
      %c0_11 = arith.constant 0 : index
      %c0_12 = arith.constant 0 : index
      %10 = vector.load %arg4[%c0_11, %c0_12] : memref<1x256xf32, #tpu.memory_space<vmem>>, vector<1x256xf32>
      %11 = vector.broadcast %10 : vector<1x256xf32> to vector<128x256xf32>
      %12 = arith.addf %9, %11 : vector<128x256xf32>
      %cst_13 = arith.constant 5.000000e-01 : f32
      %13 = vector.broadcast %cst_13 : f32 to vector<128x256xf32>
      %14 = arith.mulf %13, %12 : vector<128x256xf32>
      %cst_14 = arith.constant 0.707106769 : f32
      %15 = vector.broadcast %cst_14 : f32 to vector<128x256xf32>
      %16 = arith.mulf %12, %15 : vector<128x256xf32>
      %17 = math.erf %16 : vector<128x256xf32>
      %cst_15 = arith.constant 1.000000e+00 : f32
      %18 = vector.broadcast %cst_15 : f32 to vector<128x256xf32>
      %19 = arith.addf %18, %17 : vector<128x256xf32>
      %20 = arith.mulf %14, %19 : vector<128x256xf32>
      %21 = arith.truncf %20 : vector<128x256xf32> to vector<128x256xbf16>
      %c0_16 = arith.constant 0 : index
      %c0_17 = arith.constant 0 : index
      %22 = vector.load %arg11[%c0_16, %c0_17] : memref<128x256xbf16, #tpu.memory_space<vmem>>, vector<128x256xbf16>
      tpu.vector_store %arg11[%c0_16, %c0_17], %21 {strides = array<i32>} : memref<128x256xbf16, #tpu.memory_space<vmem>>, vector<128x256xbf16>,
      %c0_18 = arith.constant 0 : index
      %c0_19 = arith.constant 0 : index
      %23 = vector.load %arg11[%c0_18, %c0_19] : memref<128x256xbf16, #tpu.memory_space<vmem>>, vector<128x256xbf16>
      %c0_20 = arith.constant 0 : index
      %c0_21 = arith.constant 0 : index
      %24 = vector.load %arg5[%c0_20, %c0_21] : memref<256x256xbf16, #tpu.memory_space<vmem>>, vector<256x256xbf16>
      %cst_22 = arith.constant dense<0.000000e+00> : vector<128x256xf32>
      %25 = tpu.matmul %23, %24, %cst_22 {dimension_numbers = #tpu.dot_dimension_numbers<[1], [0], [0], [1], [0, 0, 1, 1], [], []>} : vector<128x256xbf16>, vector<256x256xbf16>, vector<128x256xf32> -> vector<128x256xf32>
      %c0_23 = arith.constant 0 : index
      %c0_24 = arith.constant 0 : index
      %26 = vector.load %arg6[%c0_23, %c0_24] : memref<1x256xf32, #tpu.memory_space<vmem>>, vector<1x256xf32>
      %27 = vector.broadcast %26 : vector<1x256xf32> to vector<128x256xf32>
      %28 = arith.addf %25, %27 : vector<128x256xf32>
      %cst_25 = arith.constant 5.000000e-01 : f32
      %29 = vector.broadcast %cst_25 : f32 to vector<128x256xf32>
      %30 = arith.mulf %29, %28 : vector<128x256xf32>
      %cst_26 = arith.constant 0.707106769 : f32
      %31 = vector.broadcast %cst_26 : f32 to vector<128x256xf32>
      %32 = arith.mulf %28, %31 : vector<128x256xf32>
      %33 = math.erf %32 : vector<128x256xf32>
      %cst_27 = arith.constant 1.000000e+00 : f32
      %34 = vector.broadcast %cst_27 : f32 to vector<128x256xf32>
      %35 = arith.addf %34, %33 : vector<128x256xf32>
      %36 = arith.mulf %30, %35 : vector<128x256xf32>
      %37 = arith.truncf %36 : vector<128x256xf32> to vector<128x256xbf16>
      %c0_28 = arith.constant 0 : index
      %c0_29 = arith.constant 0 : index
      %38 = vector.load %arg12[%c0_28, %c0_29] : memref<128x256xbf16, #tpu.memory_space<vmem>>, vector<128x256xbf16>
      tpu.vector_store %arg12[%c0_28, %c0_29], %37 {strides = array<i32>} : memref<128x256xbf16, #tpu.memory_space<vmem>>, vector<128x256xbf16>,
      %c0_30 = arith.constant 0 : index
      %c0_31 = arith.constant 0 : index
      %39 = vector.load %arg12[%c0_30, %c0_31] : memref<128x256xbf16, #tpu.memory_space<vmem>>, vector<128x256xbf16>
      %c0_32 = arith.constant 0 : index
      %c0_33 = arith.constant 0 : index
      %40 = vector.load %arg7[%c0_32, %c0_33] : memref<256x64xbf16, #tpu.memory_space<vmem>>, vector<256x64xbf16>
      %cst_34 = arith.constant dense<0.000000e+00> : vector<128x64xf32>
      %41 = tpu.matmul %39, %40, %cst_34 {dimension_numbers = #tpu.dot_dimension_numbers<[1], [0], [0], [1], [0, 0, 1, 1], [], []>} : vector<128x256xbf16>, vector<256x64xbf16>, vector<128x64xf32> -> vector<128x64xf32>
      %c0_35 = arith.constant 0 : index
      %c0_36 = arith.constant 0 : index
      %42 = vector.load %arg8[%c0_35, %c0_36] : memref<1x64xf32, #tpu.memory_space<vmem>>, vector<1x64xf32>
      %43 = vector.broadcast %42 : vector<1x64xf32> to vector<128x64xf32>
      %44 = arith.addf %41, %43 : vector<128x64xf32>
      %45 = arith.mulf %44, %44 : vector<128x64xf32>
      %cst_37 = arith.constant dense<0.000000e+00> : vector<128xf32>
      %46 = vector.multi_reduction <add>, %45, %cst_37 [1] : vector<128x64xf32> to vector<128xf32>
      %47 = vector.shape_cast %46 : vector<128xf32> to vector<128x1xf32>
      %cst_38 = arith.constant 1.000000e-24 : f32
      %48 = vector.broadcast %cst_38 : f32 to vector<128x1xf32>
      %49 = arith.maximumf %47, %48 : vector<128x1xf32>
      %50 = math.rsqrt %49 : vector<128x1xf32>
      %51 = vector.broadcast %50 : vector<128x1xf32> to vector<128x64xf32>
      %52 = arith.mulf %44, %51 : vector<128x64xf32>
      %53 = arith.truncf %52 : vector<128x64xf32> to vector<128x64xbf16>
      %c0_39 = arith.constant 0 : index
      %c0_40 = arith.constant 0 : index
      %54 = vector.load %arg13[%c0_39, %c0_40] : memref<128x64xbf16, #tpu.memory_space<vmem>>, vector<128x64xbf16>
      tpu.vector_store %arg13[%c0_39, %c0_40], %53 {strides = array<i32>} : memref<128x64xbf16, #tpu.memory_space<vmem>>, vector<128x64xbf16>,
    } else {
    }
    %c0 = arith.constant 0 : index
    %c0_1 = arith.constant 0 : index
    %3 = vector.load %arg13[%c0, %c0_1] : memref<128x64xbf16, #tpu.memory_space<vmem>>, vector<128x64xbf16>
    %c0_2 = arith.constant 0 : index
    %c0_3 = arith.constant 0 : index
    %4 = vector.load %arg9[%c0_2, %c0_3] : memref<64x512xbf16, #tpu.memory_space<vmem>>, vector<64x512xbf16>
    %cst = arith.constant dense<0.000000e+00> : vector<128x512xf32>
    %5 = tpu.matmul %3, %4, %cst {dimension_numbers = #tpu.dot_dimension_numbers<[1], [0], [0], [1], [0, 0, 1, 1], [], []>} : vector<128x64xbf16>, vector<64x512xbf16>, vector<128x512xf32> -> vector<128x512xf32>
    %c0_4 = arith.constant 0 : index
    %c0_5 = arith.constant 0 : index
    %6 = vector.load %arg10[%c0_4, %c0_5] : memref<128x512xf32, #tpu.memory_space<vmem>>, vector<128x512xf32>
    tpu.vector_store %arg10[%c0_4, %c0_5], %5 {strides = array<i32>} : memref<128x512xf32, #tpu.memory_space<vmem>>, vector<128x512xf32>,
    return
  }
  func.func @transform_0(%arg0: i32, %arg1: i32) -> (i32, i32) {
    %c0_i32 = arith.constant 0 : i32
    %c0_i32_0 = arith.constant 0 : i32
    return %arg0, %c0_i32 : i32, i32
  }
  func.func @transform_1(%arg0: i32, %arg1: i32) -> (i32, i32) {
    %c0_i32 = arith.constant 0 : i32
    %c0_i32_0 = arith.constant 0 : i32
    %c0_i32_1 = arith.constant 0 : i32
    return %c0_i32, %c0_i32_0 : i32, i32
  }
  func.func @transform_2(%arg0: i32, %arg1: i32) -> (i32, i32) {
    %c0_i32 = arith.constant 0 : i32
    %c0_i32_0 = arith.constant 0 : i32
    %c0_i32_1 = arith.constant 0 : i32
    return %c0_i32, %c0_i32_0 : i32, i32
  }
  func.func @transform_3(%arg0: i32, %arg1: i32) -> (i32, i32) {
    %c0_i32 = arith.constant 0 : i32
    %c0_i32_0 = arith.constant 0 : i32
    %c0_i32_1 = arith.constant 0 : i32
    return %c0_i32, %c0_i32_0 : i32, i32
  }
  func.func @transform_4(%arg0: i32, %arg1: i32) -> (i32, i32) {
    %c0_i32 = arith.constant 0 : i32
    %c0_i32_0 = arith.constant 0 : i32
    %c0_i32_1 = arith.constant 0 : i32
    return %c0_i32, %c0_i32_0 : i32, i32
  }
  func.func @transform_5(%arg0: i32, %arg1: i32) -> (i32, i32) {
    %c0_i32 = arith.constant 0 : i32
    %c0_i32_0 = arith.constant 0 : i32
    %c0_i32_1 = arith.constant 0 : i32
    return %c0_i32, %c0_i32_0 : i32, i32
  }
  func.func @transform_6(%arg0: i32, %arg1: i32) -> (i32, i32) {
    %c0_i32 = arith.constant 0 : i32
    %c0_i32_0 = arith.constant 0 : i32
    %c0_i32_1 = arith.constant 0 : i32
    return %c0_i32, %c0_i32_0 : i32, i32
  }
  func.func @transform_7(%arg0: i32, %arg1: i32) -> (i32, i32) {
    %c0_i32 = arith.constant 0 : i32
    %c0_i32_0 = arith.constant 0 : i32
    return %c0_i32, %arg1 : i32, i32
  }
  func.func @transform_8(%arg0: i32, %arg1: i32) -> (i32, i32) {
    %c0_i32 = arith.constant 0 : i32
    return %arg0, %arg1 : i32, i32
  }
}

</mosaic_0001>

<bundles_post_ra>
// kernel: tpu_custom_call.1
= control target key start
LH: loop header
LB: loop body
LE: loop exit
PB: predicated region body
PF: predicated region fallthrough
CT: control target
= control target key end

     0   :  { %s3857_s0 = inlined_call_operand.vmem [shape: bf16[256,128], index: 0, kind: input, shape index: {}]   ;;  %s3858_s1 = inlined_call_operand.hbm [shape: bf16[128,256], index: 1, kind: input, shape index: {}]   ;;  %s3859_s2 = inlined_call_operand.vmem [shape: f32[1,256], index: 2, kind: input, shape index: {}]   ;;  %s3860_s3 = inlined_call_operand.hbm [shape: bf16[256,256], index: 3, kind: input, shape index: {}]   ;;  %s3861_s4 = inlined_call_operand.vmem [shape: f32[1,256], index: 4, kind: input, shape index: {}]   ;;  %s3862_s5 = inlined_call_operand.vmem [shape: bf16[256,64], index: 5, kind: input, shape index: {}]   ;;  %s3863_s6 = inlined_call_operand.vmem [shape: f32[1,64], index: 6, kind: input, shape index: {}]   ;;  %s3864_s7 = inlined_call_operand.hbm [shape: bf16[64,512], index: 7, kind: input, shape index: {}]   ;;  %s3865_s8 = inlined_call_operand.hbm [shape: f32[256,512], index: 8, kind: output, shape index: {}]  }
   0x1   :  { %3874 = sst [smem:[#allocation20_spill]] %s3860_s3 }
   0x2   :  { %13 = vsyncpa [#allocation6], 0 }
   0x3   :  { %14 = vsyncpa [#allocation9], 0 }
   0x4   :  { %15 = vsyncpa [#allocation7], 0 }
   0x5   :  { %17 = vsyncpa [#allocation7 + $0x1], 0  ;;  %s3109_s27 = smov 0   ;;  %s3111_s28 = smov 0  }
   0x6   :  { %s3113_s29 = smov 0   ;;  %s3115_s30 = smov 0  }
   0x7   :  { %s3117_s9 = smov 0   ;;  %s3119_s10 = smov 0  }
   0x8 LB: > { %3875 = sst [smem:[#allocation15_spill]] %s3039_s29  ;;  %s2301_s11 = sadd.s32 4294967295, %s3051_s10   ;;  %s3051_s10 = sphi %s3119_s10, %s23_s10   ;;  %s3047_s9 = sphi %s3117_s9, %s3895_s9   ;;  %s3043_s30 = sphi %s3115_s30, %s3894_s30   ;;  %s3039_s29 = sphi %s3113_s29, %s3893_s29   ;;  %s3035_s28 = sphi %s3111_s28, %s3897_s28   ;;  %s3031_s27 = sphi %s3109_s27, %s3896_s27  }
   0x9   : > { %3876 = sst [smem:[#allocation16_spill]] %s3047_s9  ;;  %s2302_s12 = sadd.s32 4294967294, %s3051_s10  }
   0xa   : > { %s35_s13 = sadd.s32 1, %s3047_s9  ;;  %s222_s14 = sadd.s32 1, %s3039_s29 }
   0xb   : > { %p37_p0 = scmp.ge.s32.totalorder %s35_s13, 2  ;;  %p232_p1 = scmp.ne.s32.totalorder %s3039_s29, %s3035_s28 }
   0xc   : > { %p233_p2 = scmp.eq.s32.totalorder %s2301_s11, 1  ;;  %p238_p3 = scmp.ne.s32.totalorder %s3035_s28, %s3031_s27 }
   0xd   : > { %s3899_s13 = smov (%p37_p0, %s35_s13), 0  ;;  %p239_p5 = scmp.eq.s32.totalorder %s2302_s12, 1 }
   0xe   : > { %3877 = sst [smem:[#allocation17_spill]] %s3899_s13  ;;  %p3149_p4 = por %p233_p2, %p232_p1 }
   0xf   : > { %s217_s16 = ssub.s32 %s3047_s9, %s3899_s13  ;;  %p2303_p6 = scmp.ge.s32.totalorder %s3051_s10, 1 }
  0x10   : > { %s3878_s15 = scalar_select %p3149_p4, 1, 0 }
  0x11   : > { %p220_p7 = scmp.eq.s32.totalorder %s217_s16, 0  ;;  %p3156_p8 = por %p239_p5, %p238_p3 }
  0x12   : > { %p246_p9 = scmp.lt.s32.totalorder %s3051_s10, 3  ;;  %p3168_p11 = scmp.eq.s32.totalorder %s2301_s11, 0 }
  0x13   : > { %s3879_s17 = scalar_select %p3156_p8, 1, 0 }
  0x14   : > { %s3162_s18 = scalar_select %p220_p7, %s3039_s29, %s222_s14  }
  0x15   : > { %3880 = sst [smem:[#allocation18_spill]] %s3879_s17  ;;  %p3164_p10 = pnand %p2303_p6, %p246_p9 }
  0x16   : > { %3881 = sst [smem:[#allocation19_spill]] %s3162_s18  ;;  %s3053_s21 = smov [#allocation8]  }
  0x17   : > { %s3882_s19 = scalar_select %p3164_p10, 1, 0 }
  0x18   : > { %s3883_s20 = scalar_select %p3168_p11, 1, 0 }
  0x19   : > { %p2522_p12 = pneg %p3164_p10  ;;  %s274_s22 = sshll.u32 %s3053_s21, 4  ;;  %s275_s22 = int_to_ptr.vmem [resolvable:$true] %s274_s22 }
  0x1a   : > { %s3054_s24 = smov [#allocation5]   ;;  %s3885_s3 = sld [smem:[#allocation20_spill]] }
  0x1b   : > { %p3176_p13 = pnand %p3168_p11, %p2522_p12  ;;  %s258_s25 = sshll.u32 %s3054_s24, 4  ;;  %s259_s25 = int_to_ptr.vmem [resolvable:$true] %s258_s25 }
  0x1d   : > { %p3188_p1 = pneg %p3176_p13 }
  0x20   : > { %s2881_s11 = scalar_lea.hbm %s3885_s3, 4096 }
  0x21   : > { %p2882_p0 = scmp.ne.s32.totalorder %s3885_s3, %s2881_s11  ;;  %p2888_p5 = scmp.lt.u32.totalorder %s2881_s11, %s3885_s3 }
  0x23   : > { %p2884_p2 = pnand %p3188_p1, %p2882_p0 }
  0x25   : > { %p2885_p3 = pneg %p2884_p2 }
  0x27   : > { %p2890_p6 = pnand %p2888_p5, %p2885_p3 }
  0x29   : > { %2893 = shalt.err (!%p2890_p6)
}
  0x2a   : > { %s2894_s24 = scalar_lea.vmem %s275_s22, 4096  ;;  %p2902_p8 = scmp.lt.s32.totalorder %s275_s22, %s275_s22 }
  0x2b   : > { %p2895_p7 = scmp.ne.s32.totalorder %s275_s22, %s2894_s24  ;;  %p2903_p4 = scmp.lt.s32.totalorder %s2894_s24, %s2894_s24 }
  0x2d   : > { %p2897_p9 = pnand %p2895_p7, %p3188_p1  ;;  %p2904_p11 = por %p2903_p4, %p2902_p8 }
  0x2f   : > { %p2898_p12 = pneg %p2897_p9 }
  0x31   : > { %p2905_p10 = pnand %p2904_p11, %p2898_p12 }
  0x33   : > { %2908 = shalt.err (!%p2905_p10)
}
  0x34   : > { %s3055_s26 = smov 128   ;;  %s3056_s12 = smov 8  }
  0x35   : > { %2528 = dma.hbm_to_vmem [thread:$0]  (!%p3176_p13), %s3885_s3, 4096, %s275_s22, [#allocation9], %s3055_s26, %s3055_s26, %s3056_s12  }
  0x36   : > { %s2909_s16 = scalar_lea.hbm %s3858_s1, 2048 }
  0x37   : > { %p2910_p4 = scmp.ne.s32.totalorder %s3858_s1, %s2909_s16  ;;  %p2916_p11 = scmp.lt.u32.totalorder %s2909_s16, %s3858_s1 }
  0x39   : > { %p2912_p8 = pnand %p2910_p4, %p3188_p1 }
  0x3b   : > { %p2913_p10 = pneg %p2912_p8 }
  0x3d   : > { %p2918_p0 = pnand %p2916_p11, %p2913_p10 }
  0x3f   : > { %2921 = shalt.err (!%p2918_p0)
}
  0x40   : > { %s2922_s9 = scalar_lea.vmem %s259_s25, 2048  ;;  %p2930_p6 = scmp.lt.s32.totalorder %s259_s25, %s259_s25 }
  0x41   : > { %p2923_p2 = scmp.ne.s32.totalorder %s259_s25, %s2922_s9  ;;  %p2931_p7 = scmp.lt.s32.totalorder %s2922_s9, %s2922_s9 }
  0x43   : > { %p2925_p3 = pnand %p2923_p2, %p3188_p1  ;;  %p2932_p9 = por %p2931_p7, %p2930_p6 }
  0x45   : > { %p2926_p5 = pneg %p2925_p3 }
  0x47   : > { %p2933_p12 = pnand %p2932_p9, %p2926_p5 }
  0x49   : > { %2936 = shalt.err (!%p2933_p12)
}
  0x4a   : > { %2525 = dma.hbm_to_vmem [thread:$0]  (!%p3176_p13), %s3858_s1, 2048, %s259_s25, [#allocation6], %s3055_s26, %s3055_s26, %s3056_s12  }
  0x4b   : > { %s3057_s17 = smov [#allocation10]   ;;  %s2937_s14 = scalar_lea.hbm %s3864_s7, 2048 }
  0x4c   : > { %s299_s22 = sshll.u32 %s3057_s17, 4  ;;  %p2938_p4 = scmp.ne.s32.totalorder %s3864_s7, %s2937_s14  ;;  %s300_s22 = int_to_ptr.vmem [resolvable:$true] %s299_s22 }
  0x4d   : > { %p2944_p11 = scmp.lt.u32.totalorder %s2937_s14, %s3864_s7 }
  0x4e   : > { %p2940_p8 = pnand %p2938_p4, %p3188_p1 }
  0x50   : > { %p2941_p10 = pneg %p2940_p8 }
  0x52   : > { %p2946_p0 = pnand %p2944_p11, %p2941_p10 }
  0x54   : > { %2949 = shalt.err (!%p2946_p0)
}
  0x55   : > { %s2950_s25 = scalar_lea.vmem %s300_s22, 2048  ;;  %p2958_p6 = scmp.lt.s32.totalorder %s300_s22, %s300_s22 }
  0x56   : > { %p2951_p2 = scmp.ne.s32.totalorder %s300_s22, %s2950_s25  ;;  %p2959_p7 = scmp.lt.s32.totalorder %s2950_s25, %s2950_s25 }
  0x58   : > { %p2953_p3 = pnand %p2951_p2, %p3188_p1  ;;  %p2960_p9 = por %p2959_p7, %p2958_p6 }
  0x5a   : > { %p2954_p5 = pneg %p2953_p3 }
  0x5c   : > { %p2961_p12 = pnand %p2960_p9, %p2954_p5 }
  0x5e   : > { %2964 = shalt.err (!%p2961_p12)
}
  0x5f   : > { %s3058_s26 = smov 256   ;;  %s3059_s12 = smov 16  }
  0x60   : > { %2531 = dma.hbm_to_vmem [thread:$0]  (!%p3176_p13), %s3864_s7, 2048, %s300_s22, [#allocation9], %s3058_s26, %s3058_s26, %s3059_s12  }
  0x61   : > { %p3887_p4 = scmp.ne.s32.totalorder %s3882_s19, 0 }
  0x62   : > { %p3888_p8 = scmp.ne.s32.totalorder (!%p3887_p4), %s3883_s20, 0 }
  0x63   : > { %324 = sbr.rel (%p3887_p4) target bundleno = 1293 (0x50d), region = 52 }
  0x6a   : > { %3018 = dma.done.wait (%p3888_p8), [#allocation6], 2048  }
  0x6b   : > { %3020 = vsyncadd (%p3888_p8), [#allocation6], 4294965248 }
  0x6c   : > { %3022 = dma.done.wait (%p3888_p8), [#allocation9], 6144  }
  0x6d   : > { %3024 = vsyncadd (%p3888_p8), [#allocation9], 4294961152  ;;  %v3060_v0 = vmov 0   ;;  %s2313_s23 = sshll.u32 %s3043_s30, 4  ;;  %v2601_v1 = vld [vmem:[#allocation5 + $0x4] ss:$8 sps:$4 sm:$0xff]  }
  0x6e   : > { %584 = vmatprep.mubr.bf16.mxu0 %v3060_v0  ;;  %p367_p13 = scmp.lt.s32.totalorder %s2313_s23, 31  ;;  %v2603_v2 = vld [vmem:[#allocation5] ss:$8 sps:$4 sm:$0xff]   ;;  %552 = vmatprep.subr.bf16.mxu0 %v2601_v1  ;;  %v2604_v3 = vld [vmem:[#allocation5 + $0x14] ss:$8 sps:$4 sm:$0xff]   ;;  %vm1646_vm0 = vcmask 523264  }
  0x6f   : > { %553 = vmatpush1.bf16.msra.mxu0 %v2603_v2  ;;  %v2606_v4 = vld [vmem:[#allocation5 + $0x10] ss:$8 sps:$4 sm:$0xff]   ;;  %v2607_v5 = vld [vmem:[#allocation5 + $0x24] ss:$8 sps:$4 sm:$0xff]   ;;  %v2609_v6 = vld [vmem:[#allocation5 + $0x20] ss:$8 sps:$4 sm:$0xff]  }
  0x70   : > { %s3901_s23 = smov (!%p367_p13, %s2313_s23), 31  ;;  %554 = vmatprep.subr.bf16.mxu0 %v2604_v3  ;;  %v2610_v7 = vld [vmem:[#allocation5 + $0x34] ss:$8 sps:$4 sm:$0xff]   ;;  %v2612_v8 = vld [vmem:[#allocation5 + $0x30] ss:$8 sps:$4 sm:$0xff]   ;;  %v2681_v57 = vld [vmem:[%s3862_s5 + $0x40] sm:$0xff]  }
  0x71   : > { %s2314_s19 = sshll.u32 %s3901_s23, 2  ;;  %v2613_v9 = vld [vmem:[#allocation5 + $0x44] ss:$8 sps:$4 sm:$0xff]   ;;  %v2615_v10 = vld [vmem:[#allocation5 + $0x40] ss:$8 sps:$4 sm:$0xff]   ;;  %v3295_v61 = vld [vmem:[%s3862_s5 + $0x50] sm:$0xff]  }
  0x72   : > { %s3255_s18 = scalar_lea.vmem %s3857_s0, %s2314_s19  ;;  %v2616_v11 = vld [vmem:[#allocation5 + $0x54] ss:$8 sps:$4 sm:$0xff]   ;;  %v2618_v12 = vld [vmem:[#allocation5 + $0x50] ss:$8 sps:$4 sm:$0xff]   ;;  %v2619_v13 = vld [vmem:[#allocation5 + $0x64] ss:$8 sps:$4 sm:$0xff]  }
  0x73   : > { %555 = vmatpush1.bf16.msra.mxu0 %v2606_v4  ;;  %v2633_v14 = vld [vmem:[#allocation8 + $0x4] ss:$8 sps:$4 sm:$0xff]   ;;  %v2635_v15 = vld [vmem:[#allocation8] ss:$8 sps:$4 sm:$0xff]   ;;  %v2636_v16 = vld [vmem:[#allocation8 + $0x14] ss:$8 sps:$4 sm:$0xff]   ;;  %v414_v4 = vlaneseq }
  0x74   : > { %556 = vmatprep.subr.bf16.mxu0 %v2607_v5  ;;  %1077 = vmatprep.subr.bf16.mxu1 %v2633_v14  ;;  %v2638_v17 = vld [vmem:[#allocation8 + $0x10] ss:$8 sps:$4 sm:$0xff]   ;;  %v2621_v18 = vld [vmem:[#allocation5 + $0x60] ss:$8 sps:$4 sm:$0xff]   ;;  %v2639_v19 = vld [vmem:[#allocation8 + $0x24] ss:$8 sps:$4 sm:$0xff]  }
  0x75   : > { %1078 = vmatpush1.bf16.msra.mxu1 %v2635_v15  ;;  %v2622_v20 = vld [vmem:[#allocation5 + $0x74] ss:$8 sps:$4 sm:$0xff]   ;;  %v2641_v21 = vld [vmem:[#allocation8 + $0x20] ss:$8 sps:$4 sm:$0xff]   ;;  %v2624_v22 = vld [vmem:[#allocation5 + $0x70] ss:$8 sps:$4 sm:$0xff]  }
  0x76   : > { %1079 = vmatprep.subr.bf16.mxu1 %v2636_v16  ;;  %v2642_v23 = vld [vmem:[#allocation8 + $0x34] ss:$8 sps:$4 sm:$0xff]   ;;  %v2625_v24 = vld [vmem:[%s3255_s18] sm:$0xff]   ;;  %v2644_v25 = vld [vmem:[#allocation8 + $0x30] ss:$8 sps:$4 sm:$0xff]   ;;  %v3329_v5 = vshrl.u32 %v414_v4, 7 }
  0x77   : > { %557 = vmatpush1.bf16.msra.mxu0 %v2609_v6  ;;  %v2645_v26 = vld [vmem:[#allocation8 + $0x44] ss:$8 sps:$4 sm:$0xff]   ;;  %v2647_v27 = vld [vmem:[#allocation8 + $0x40] ss:$8 sps:$4 sm:$0xff]   ;;  %v2648_v28 = vld [vmem:[#allocation8 + $0x54] ss:$8 sps:$4 sm:$0xff]  }
  0x78   : > { %558 = vmatprep.subr.bf16.mxu0 %v2610_v7  ;;  %v2626_v29 = vld [vmem:[%s3255_s18 + $0x8] sm:$0xff]   ;;  %v2650_v30 = vld [vmem:[#allocation8 + $0x50] ss:$8 sps:$4 sm:$0xff]   ;;  %v2654_v33 = vld [vmem:[#allocation8 + $0x74] ss:$8 sps:$4 sm:$0xff]   ;;  %v416_v6 = vsub.s32 0, %v3329_v5 }
  0x79   : > { %1080 = vmatpush1.bf16.msra.mxu1 %v2638_v17  ;;  %v2651_v31 = vld [vmem:[#allocation8 + $0x64] ss:$8 sps:$4 sm:$0xff]   ;;  %v2653_v32 = vld [vmem:[#allocation8 + $0x60] ss:$8 sps:$4 sm:$0xff]   ;;  %v2627_v34 = vld [vmem:[%s3255_s18 + $0x10] sm:$0xff]   ;;  %s363_s13 = sand.u32 1, %s3035_s28  }
  0x7a   : > { %1081 = vmatprep.subr.bf16.mxu1 %v2639_v19  ;;  %v2656_v35 = vld [vmem:[#allocation8 + $0x70] ss:$8 sps:$4 sm:$0xff]   ;;  %v2657_v36 = vld [vmem:[#allocation8 + $0x84] ss:$8 sps:$4 sm:$0xff]   ;;  %v2659_v37 = vld [vmem:[#allocation8 + $0x80] ss:$8 sps:$4 sm:$0xff]  }
  0x7b   : > { %559 = vmatpush1.bf16.msra.mxu0 %v2612_v8  ;;  %v2660_v38 = vld [vmem:[#allocation8 + $0x94] ss:$8 sps:$4 sm:$0xff]   ;;  %v2662_v40 = vld [vmem:[#allocation8 + $0x90] ss:$8 sps:$4 sm:$0xff]   ;;  %v2629_v41 = vld [vmem:[%s3255_s18 + $0x20] sm:$0xff]   ;;  %v420_v8 = vsub.s32 1, %v3329_v5 }
  0x7c   : > { %560 = vmatprep.subr.bf16.mxu0 %v2613_v9  ;;  %v2628_v39 = vld [vmem:[%s3255_s18 + $0x18] sm:$0xff]   ;;  %v2630_v42 = vld [vmem:[%s3255_s18 + $0x28] sm:$0xff]   ;;  %v2631_v43 = vld [vmem:[%s3255_s18 + $0x30] sm:$0xff]   ;;  %s2312_s11 = sshll.u32 %s363_s13, 9  ;;  %s2427_s16 = sshll.u32 %s3043_s30, 13 }
  0x7d   : > { %1082 = vmatpush1.bf16.msra.mxu1 %v2641_v21  ;;  %v2632_v44 = vld [vmem:[%s3255_s18 + $0x38] sm:$0xff]   ;;  %v2663_v45 = vld [vmem:[#allocation8 + $0xa4] ss:$8 sps:$4 sm:$0xff]   ;;  %v2665_v46 = vld [vmem:[#allocation8 + $0xa0] ss:$8 sps:$4 sm:$0xff]   ;;  %s3734_s14 = scalar_lea.vmem [#allocation11], %s2312_s11  ;;  %s3799_s26 = scalar_lea.hbm %s3865_s8, %s2427_s16 }
  0x7e   : > { %1083 = vmatprep.subr.bf16.mxu1 %v2642_v23  ;;  %v2666_v47 = vld [vmem:[#allocation8 + $0xb4] ss:$8 sps:$4 sm:$0xff]   ;;  %v2668_v48 = vld [vmem:[#allocation8 + $0xb0] ss:$8 sps:$4 sm:$0xff]   ;;  %v2669_v49 = vld [vmem:[#allocation8 + $0xc4] ss:$8 sps:$4 sm:$0xff]  }
  0x7f   : > { %561 = vmatpush1.bf16.msra.mxu0 %v2615_v10  ;;  %v2671_v50 = vld [vmem:[#allocation8 + $0xc0] ss:$8 sps:$4 sm:$0xff]   ;;  %v2672_v51 = vld [vmem:[#allocation8 + $0xd4] ss:$8 sps:$4 sm:$0xff]   ;;  %v2674_v52 = vld [vmem:[#allocation8 + $0xd0] ss:$8 sps:$4 sm:$0xff]  }
  0x80   : > { %562 = vmatprep.subr.bf16.mxu0 %v2616_v11  ;;  %v2675_v53 = vld [vmem:[#allocation8 + $0xe4] ss:$8 sps:$4 sm:$0xff]   ;;  %v2677_v54 = vld [vmem:[#allocation8 + $0xe0] ss:$8 sps:$4 sm:$0xff]   ;;  %v2678_v55 = vld [vmem:[#allocation8 + $0xf4] ss:$8 sps:$4 sm:$0xff]  }
  0x81   : > { %1084 = vmatpush1.bf16.msra.mxu1 %v2644_v25  ;;  %v2680_v56 = vld [vmem:[#allocation8 + $0xf0] ss:$8 sps:$4 sm:$0xff]   ;;  %v3278_v58 = vld [vmem:[%s3862_s5] sm:$0xff]   ;;  %v3283_v59 = vld [vmem:[%s3862_s5 + $0x48] sm:$0xff]   ;;  %s2195_s24 = sshll.u32 %s3734_s14, 4  ;;  %s3811_s30 = scalar_lea.sflag [#allocation7], %s363_s13  ;;  %s3801_s24 = int_to_ptr.vmem [resolvable:$true] %s2195_s24 }
  0x82   : > { %1085 = vmatprep.subr.bf16.mxu1 %v2645_v26  ;;  %v3289_v60 = vld [vmem:[%s3862_s5 + $0x8] sm:$0xff]   ;;  %v3301_v62 = vld [vmem:[%s3862_s5 + $0x10] sm:$0xff]   ;;  %v3307_v63 = vld [vmem:[%s3862_s5 + $0x58] sm:$0xff]   ;;  %s2965_s12 = scalar_lea.vmem %s3801_s24, 8192  ;;  %p3889_p10 = scmp.ne.s32.totalorder %s3878_s15, 0 }
  0x83   : > { %563 = vmatpush1.bf16.msra.mxu0 %v2618_v12  ;;  %v3313_v1 = vld [vmem:[%s3862_s5 + $0x18] sm:$0xff]   ;;  %v3319_v2 = vld [vmem:[%s3862_s5 + $0x60] sm:$0xff]   ;;  %p2966_p1 = scmp.ne.s32.totalorder %s3801_s24, %s2965_s12  ;;  %s3061_s29 = smov [#allocation11]  }
  0x84   : > { %564 = vmatprep.subr.bf16.mxu0 %v2619_v13  ;;  %v3325_v3 = vld [vmem:[%s3862_s5 + $0x20] sm:$0xff]   ;;  %s2969_s3 = sshll.u32 %s3061_s29, 4  ;;  %s2970_s3 = int_to_ptr.vmem [resolvable:$false] %s2969_s3 }
  0x85   : > { %1086 = vmatpush1.bf16.msra.mxu1 %v2647_v27  ;;  %v412_v7 = vld [vmem:[%s3859_s2] sm:$0x3]  ;;  %p2967_p11 = pnand %p2966_p1, %p3889_p10  ;;  %s2971_s23 = scalar_lea.vmem %s2970_s3, 16384 }
  0x86   : > { %1087 = vmatprep.subr.bf16.mxu1 %v2648_v28  ;;  %v3338_v9 = vrot.slane %v412_v7, %v416_v6  ;;  %v3342_v10 = vrot.slane %v412_v7, %v420_v8  ;;  %p2972_p2 = scmp.lt.s32.totalorder %s3801_s24, %s2970_s3  ;;  %p2973_p3 = scmp.lt.s32.totalorder %s2971_s23, %s2965_s12 }
  0x87   : > { %565 = vmatpush1.bf16.msra.mxu0 %v2621_v18  ;;  %p2968_p0 = pneg %p2967_p11 }
  0x88   : > { %566 = vmatprep.subr.bf16.mxu0 %v2622_v20  ;;  %p2974_p5 = por %p2973_p3, %p2972_p2 }
  0x89   : > { %1088 = vmatpush1.bf16.msra.mxu1 %v2650_v30 }
  0x8a   : > { %1089 = vmatprep.subr.bf16.mxu1 %v2651_v31  ;;  %p2975_p6 = pnand %p2974_p5, %p2968_p0 }
  0x8b   : > { %567 = vmatpush1.bf16.msra.mxu0 %v2624_v22 }
  0x8c   : > { %2428 = vmatprep.subr.bf16.mxu0 %v2681_v57 }
  0x8d   : > { %1090 = vmatpush1.bf16.msra.mxu1 %v2653_v32 }
  0x8e   : > { %585 = vmatmul.mubr.bf16.vlgmr.msra.gmra.mrb[0].mxu0 %v2625_v24  ;;  %1091 = vmatprep.subr.bf16.mxu1 %v2654_v33 }
  0x8f   : > { %594 = vmatprep.mubr.bf16.mxu0 %v3060_v0  ;;  %2429 = vmatpush3.bf16.msra.mxu0 %v3278_v58 }
  0x90   : > { %2430 = vmatprep.subr.bf16.mxu0 %v3283_v59 }
  0x91   : > { %1092 = vmatpush1.bf16.msra.mxu1 %v2656_v35 }
  0x92   : > { %1093 = vmatprep.subr.bf16.mxu1 %v2657_v36 }
  0x93   : > { %2431 = vmatpush3.bf16.msra.mxu0 %v3289_v60 }
  0x94   : > { %2432 = vmatprep.subr.bf16.mxu0 %v3295_v61 }
  0x95   : > { %1094 = vmatpush1.bf16.msra.mxu1 %v2659_v37 }
  0x96   : > { %595 = vmatmul.mubr.bf16.gmra.mrb[4].mxu0 %v2626_v29  ;;  %1095 = vmatprep.subr.bf16.mxu1 %v2660_v38 }
  0x97   : > { %604 = vmatprep.mubr.bf16.mxu0 %v3060_v0  ;;  %2433 = vmatpush3.bf16.msra.mxu0 %v3301_v62 }
  0x98   : > { %2434 = vmatprep.subr.bf16.mxu0 %v3307_v63 }
  0x99   : > { %1096 = vmatpush1.bf16.msra.mxu1 %v2662_v40 }
  0x9a   : > { %1097 = vmatprep.subr.bf16.mxu1 %v2663_v45 }
  0x9b   : > { %2435 = vmatpush3.bf16.msra.mxu0 %v3313_v1 }
  0x9c   : > { %2436 = vmatprep.subr.bf16.mxu0 %v3319_v2 }
  0x9d   : > { %1098 = vmatpush1.bf16.msra.mxu1 %v2665_v46 }
  0x9e   : > { %605 = vmatmul.mubr.bf16.gmra.mrb[8].mxu0 %v2627_v34  ;;  %1099 = vmatprep.subr.bf16.mxu1 %v2666_v47 }
  0x9f   : > { %614 = vmatprep.mubr.bf16.mxu0 %v3060_v0  ;;  %2437 = vmatpush3.bf16.msra.mxu0 %v3325_v3 }
  0xa1   : > { %1100 = vmatpush1.bf16.msra.mxu1 %v2668_v48 }
  0xa2   : > { %1101 = vmatprep.subr.bf16.mxu1 %v2669_v49 }
  0xa5   : > { %1102 = vmatpush1.bf16.msra.mxu1 %v2671_v50 }
  0xa6   : > { %615 = vmatmul.mubr.bf16.gmra.mrb[12].mxu0 %v2628_v39  ;;  %1103 = vmatprep.subr.bf16.mxu1 %v2672_v51 }
  0xa7   : > { %624 = vmatprep.mubr.bf16.mxu0 %v3060_v0 }
  0xa9   : > { %1104 = vmatpush1.bf16.msra.mxu1 %v2674_v52 }
  0xaa   : > { %1105 = vmatprep.subr.bf16.mxu1 %v2675_v53 }
  0xad   : > { %1106 = vmatpush1.bf16.msra.mxu1 %v2677_v54 }
  0xae   : > { %625 = vmatmul.mubr.bf16.gmra.mrb[16].mxu0 %v2629_v41  ;;  %1107 = vmatprep.subr.bf16.mxu1 %v2678_v55 }
  0xaf   : > { %634 = vmatprep.mubr.bf16.mxu0 %v3060_v0 }
  0xb1   : > { %1108 = vmatpush1.bf16.msra.mxu1 %v2680_v56 }
  0xb2   : > { %2492 = vmatprep.subr.bf16.mxu1 %v2681_v57 }
  0xb6   : > { %635 = vmatmul.mubr.bf16.gmra.mrb[20].mxu0 %v2630_v42 }
  0xb7   : > { %644 = vmatprep.mubr.bf16.mxu0 %v3060_v0 }
  0xbe   : > { %645 = vmatmul.mubr.bf16.gmra.mrb[24].mxu0 %v2631_v43 }
  0xbf   : > { %654 = vmatprep.mubr.bf16.mxu0 %v3060_v0 }
  0xc6   : > { %655 = vmatmul.mubr.bf16.gmra.mrb[28].mxu0 %v2632_v44 }
 0x161   : > { %v586_v11 = vpop.f32.mrb[0].mxu0 }
 0x162   : > { %v587_v12 = vadd.f32 %v586_v11, %v3338_v9  ;;  %v588_v13 = vpop.f32.mrb[1].mxu0 }
 0x163   : > { %v589_v14 = vadd.f32 %v588_v13, %v3342_v10  ;;  %v590_v15 = vpop.f32.mrb[2].mxu0 }
 0x164   : > { %v697_v16 = vmul.f32 0.70710677, %v587_v12  ;;  %v591_v17 = vadd.f32 %v590_v15, %v3338_v9  ;;  %v592_v18 = vpop.f32.mrb[3].mxu0  ;;  %v665_v39 = vmul.f32 0.5, %v587_v12 }
 0x165   : > { %v698_v19 = vmul.f32 0.70710677, %v589_v14  ;;  %v593_v20 = vadd.f32 %v592_v18, %v3342_v10  ;;  %v666_v49 = vmul.f32 0.5, %v589_v14 }
 0x166   : > { %2721 = verf.f32 %v697_v16  ;;  %v699_v21 = vmul.f32 0.70710677, %v591_v17  ;;  %v667_v44 = vmul.f32 0.5, %v591_v17 }
 0x167   : > { %2723 = verf.f32 %v698_v19  ;;  %v700_v22 = vmul.f32 0.70710677, %v593_v20  ;;  %v668_v55 = vmul.f32 0.5, %v593_v20 }
 0x168   : > { %2725 = verf.f32 %v699_v21 }
 0x169   : > { %2727 = verf.f32 %v700_v22  ;;  %v596_v23 = vpop.f32.mrb[4].mxu0 }
 0x16a   : > { %v597_v24 = vadd.f32 %v596_v23, %v3338_v9  ;;  %v598_v25 = vpop.f32.mrb[5].mxu0 }
 0x16b   : > { %v599_v26 = vadd.f32 %v598_v25, %v3342_v10  ;;  %v600_v27 = vpop.f32.mrb[6].mxu0 }
 0x16c   : > { %v701_v28 = vmul.f32 0.70710677, %v597_v24  ;;  %v601_v29 = vadd.f32 %v600_v27, %v3338_v9  ;;  %v602_v30 = vpop.f32.mrb[7].mxu0  ;;  %v669_v27 = vmul.f32 0.5, %v597_v24 }
 0x16d   : > { %v702_v31 = vmul.f32 0.70710677, %v599_v26  ;;  %v603_v32 = vadd.f32 %v602_v30, %v3342_v10 }
 0x16e   : > { %2729 = verf.f32 %v701_v28  ;;  %v703_v33 = vmul.f32 0.70710677, %v601_v29  ;;  %v671_v28 = vmul.f32 0.5, %v601_v29 }
 0x16f   : > { %2731 = verf.f32 %v702_v31  ;;  %v704_v34 = vmul.f32 0.70710677, %v603_v32 }
 0x170   : > { %v2722_v35 = vpop.eup %2721  ;;  %2733 = verf.f32 %v703_v33 }
 0x171   : > { %v2724_v36 = vpop.eup %2723  ;;  %2735 = verf.f32 %v704_v34  ;;  %v606_v37 = vpop.f32.mrb[8].mxu0  ;;  %v761_v40 = vadd.f32 1.0, %v2722_v35  ;;  %v670_v34 = vmul.f32 0.5, %v599_v26  ;;  %v672_v35 = vmul.f32 0.5, %v603_v32 }
 0x172   : > { %v2726_v38 = vpop.eup %2725  ;;  %v3353_v41 = vadd.f32 %v606_v37, %v3338_v9  ;;  %v608_v42 = vpop.f32.mrb[9].mxu0  ;;  %v762_v48 = vadd.f32 1.0, %v2724_v36 }
 0x173   : > { %v2728_v43 = vpop.eup %2727  ;;  %v763_v45 = vadd.f32 1.0, %v2726_v38  ;;  %v3356_v46 = vadd.f32 %v608_v42, %v3342_v10  ;;  %v610_v47 = vpop.f32.mrb[10].mxu0  ;;  %v793_v4 = vmul.f32 %v761_v40, %v665_v39 }
 0x174   : > { %v705_v50 = vmul.f32 0.70710677, %v3353_v41  ;;  %v3360_v51 = vadd.f32 %v610_v47, %v3338_v9  ;;  %v612_v52 = vpop.f32.mrb[11].mxu0  ;;  %v764_v53 = vadd.f32 1.0, %v2728_v43  ;;  %v794_v12 = vmul.f32 %v762_v48, %v666_v49 }
 0x175   : > { %v795_v54 = vmul.f32 %v763_v45, %v667_v44  ;;  %v706_v56 = vmul.f32 0.70710677, %v3356_v46  ;;  %v3364_v57 = vadd.f32 %v612_v52, %v3342_v10 }
 0x176   : > { %2737 = verf.f32 %v705_v50  ;;  %v707_v7 = vmul.f32 0.70710677, %v3360_v51  ;;  %v796_v13 = vmul.f32 %v764_v53, %v668_v55 }
 0x177   : > { %2739 = verf.f32 %v706_v56  ;;  %v708_v11 = vmul.f32 0.70710677, %v3364_v57  ;;  %v825_v15 = vpack.c.bf16 %v795_v54, %v793_v4  ;;  %v673_v56 = vmul.f32 0.5, %v3353_v41 }
 0x178   : > { %v2730_v14 = vpop.eup %2729  ;;  %2741 = verf.f32 %v707_v7  ;;  %v826_v19 = vpack.c.bf16 %v796_v13, %v794_v12  ;;  %v675_v4 = vmul.f32 0.5, %v3360_v51  ;;  %v674_v12 = vmul.f32 0.5, %v3356_v46 }
 0x179   : > { %v2732_v16 = vpop.eup %2731  ;;  %v765_v17 = vadd.f32 1.0, %v2730_v14  ;;  %2743 = verf.f32 %v708_v11  ;;  %v616_v18 = vpop.f32.mrb[12].mxu0  ;;  %v676_v13 = vmul.f32 0.5, %v3364_v57 }
 0x17a   : > { %v2734_v20 = vpop.eup %2733  ;;  %v766_v21 = vadd.f32 1.0, %v2732_v16  ;;  %v3369_v22 = vadd.f32 %v616_v18, %v3338_v9  ;;  %v618_v23 = vpop.f32.mrb[13].mxu0  ;;  %1109 = vmatprep.mubr.bf16.mxu1 %v826_v19 }
 0x17b   : > { %v2736_v25 = vpop.eup %2735  ;;  %v767_v30 = vadd.f32 1.0, %v2734_v20  ;;  %v3372_v31 = vadd.f32 %v618_v23, %v3342_v10  ;;  %v620_v33 = vpop.f32.mrb[14].mxu0  ;;  %1110 = vmatmul.mubr.bf16.vlgmr.msra.gmra.mrb[0].mxu1 %v825_v15  ;;  %v797_v39 = vmul.f32 %v765_v17, %v669_v27 }
 0x17c   : > { %v768_v36 = vadd.f32 1.0, %v2736_v25  ;;  %v709_v37 = vmul.f32 0.70710677, %v3369_v22  ;;  %v622_v38 = vpop.f32.mrb[15].mxu0  ;;  %v3377_v24 = vadd.f32 %v620_v33, %v3338_v9  ;;  %2500 = vmatpush3.bf16.msra.mxu1 %v3278_v58  ;;  %v798_v29 = vmul.f32 %v766_v21, %v670_v34 }
 0x17d   : > { %v799_v40 = vmul.f32 %v767_v30, %v671_v28  ;;  %v710_v42 = vmul.f32 0.70710677, %v3372_v31  ;;  %v3381_v26 = vadd.f32 %v622_v38, %v3342_v10  ;;  %2493 = vmatprep.subr.bf16.mxu1 %v3283_v59  ;;  %v677_v34 = vmul.f32 0.5, %v3369_v22 }
 0x17e   : > { %v800_v43 = vmul.f32 %v768_v36, %v672_v35  ;;  %2745 = verf.f32 %v709_v37  ;;  %v711_v32 = vmul.f32 0.70710677, %v3377_v24 }
 0x17f   : > { %2747 = verf.f32 %v710_v42  ;;  %v827_v44 = vpack.c.bf16 %v799_v40, %v797_v39  ;;  %v712_v47 = vmul.f32 0.70710677, %v3381_v26  ;;  %v679_v39 = vmul.f32 0.5, %v3377_v24 }
 0x180   : > { %v2738_v45 = vpop.eup %2737  ;;  %v828_v48 = vpack.c.bf16 %v800_v43, %v798_v29  ;;  %2749 = verf.f32 %v711_v32  ;;  %2501 = vmatpush3.bf16.msra.mxu1 %v3289_v60 }
 0x181   : > { %v2740_v49 = vpop.eup %2739  ;;  %v769_v50 = vadd.f32 1.0, %v2738_v45  ;;  %v626_v58 = vpop.f32.mrb[16].mxu0  ;;  %2751 = verf.f32 %v712_v47  ;;  %2494 = vmatprep.subr.bf16.mxu1 %v3295_v61 }
 0x182   : > { %v2742_v52 = vpop.eup %2741  ;;  %v770_v53 = vadd.f32 1.0, %v2740_v49  ;;  %v3388_v54 = vadd.f32 %v626_v58, %v3338_v9  ;;  %v628_v59 = vpop.f32.mrb[17].mxu0  ;;  %1119 = vmatprep.mubr.bf16.mxu1 %v828_v48 }
 0x183   : > { %v2744_v55 = vpop.eup %2743  ;;  %v771_v7 = vadd.f32 1.0, %v2742_v52  ;;  %v3394_v11 = vadd.f32 %v628_v59, %v3342_v10  ;;  %v630_v60 = vpop.f32.mrb[18].mxu0  ;;  %1120 = vmatmul.mubr.bf16.gmra.mrb[4].mxu1 %v827_v44  ;;  %v801_v61 = vmul.f32 %v769_v50, %v673_v56 }
 0x184   : > { %v772_v14 = vadd.f32 1.0, %v2744_v55  ;;  %v713_v15 = vmul.f32 0.70710677, %v3388_v54  ;;  %v632_v16 = vpop.f32.mrb[19].mxu0  ;;  %v3401_v51 = vadd.f32 %v630_v60, %v3338_v9  ;;  %2502 = vmatpush3.bf16.msra.mxu1 %v3301_v62  ;;  %v802_v18 = vmul.f32 %v770_v53, %v674_v12 }
 0x185   : > { %v803_v17 = vmul.f32 %v771_v7, %v675_v4  ;;  %v714_v41 = vmul.f32 0.70710677, %v3394_v11  ;;  %v3405_v46 = vadd.f32 %v632_v16, %v3342_v10  ;;  %2495 = vmatprep.subr.bf16.mxu1 %v3307_v63  ;;  %v681_v4 = vmul.f32 0.5, %v3388_v54 }
 0x186   : > { %v804_v19 = vmul.f32 %v772_v14, %v676_v13  ;;  %2753 = verf.f32 %v713_v15  ;;  %v715_v57 = vmul.f32 0.70710677, %v3401_v51  ;;  %v682_v14 = vmul.f32 0.5, %v3394_v11 }
 0x187   : > { %2755 = verf.f32 %v714_v41  ;;  %v829_v20 = vpack.c.bf16 %v803_v17, %v801_v61  ;;  %v716_v23 = vmul.f32 0.70710677, %v3405_v46  ;;  %v683_v15 = vmul.f32 0.5, %v3401_v51 }
 0x188   : > { %v2746_v21 = vpop.eup %2745  ;;  %v830_v25 = vpack.c.bf16 %v804_v19, %v802_v18  ;;  %2757 = verf.f32 %v715_v57  ;;  %2503 = vmatpush3.bf16.msra.mxu1 %v3313_v1  ;;  %v678_v1 = vmul.f32 0.5, %v3372_v31  ;;  %v684_v41 = vmul.f32 0.5, %v3405_v46 }
 0x189   : > { %v2748_v27 = vpop.eup %2747  ;;  %v636_v28 = vpop.f32.mrb[20].mxu0  ;;  %v773_v62 = vadd.f32 1.0, %v2746_v21  ;;  %2759 = verf.f32 %v716_v23  ;;  %2496 = vmatprep.subr.bf16.mxu1 %v3319_v2  ;;  %v680_v2 = vmul.f32 0.5, %v3381_v26 }
 0x18a   : > { %v3412_v30 = vadd.f32 %v636_v28, %v3338_v9  ;;  %v638_v33 = vpop.f32.mrb[21].mxu0  ;;  %1129 = vmatprep.mubr.bf16.mxu1 %v830_v25  ;;  %v2750_v63 = vpop.eup %2749  ;;  %v774_v35 = vadd.f32 1.0, %v2748_v27 }
 0x18b   : > { %v3417_v36 = vadd.f32 %v638_v33, %v3342_v10  ;;  %v640_v37 = vpop.f32.mrb[22].mxu0  ;;  %v2752_v38 = vpop.eup %2751  ;;  %v775_v40 = vadd.f32 1.0, %v2750_v63  ;;  %1130 = vmatmul.mubr.bf16.gmra.mrb[8].mxu1 %v829_v20  ;;  %v805_v44 = vmul.f32 %v773_v62, %v677_v34 }
 0x18c   : > { %v717_v42 = vmul.f32 0.70710677, %v3412_v30  ;;  %v642_v29 = vpop.f32.mrb[23].mxu0  ;;  %v776_v43 = vadd.f32 1.0, %v2752_v38  ;;  %v3425_v32 = vadd.f32 %v640_v37, %v3338_v9  ;;  %2504 = vmatpush3.bf16.msra.mxu1 %v3325_v3  ;;  %v806_v24 = vmul.f32 %v774_v35, %v678_v1 }
 0x18d   : > { %v718_v22 = vmul.f32 0.70710677, %v3417_v36  ;;  %v807_v45 = vmul.f32 %v775_v40, %v679_v39  ;;  %v3429_v31 = vadd.f32 %v642_v29, %v3342_v10  ;;  %v685_v38 = vmul.f32 0.5, %v3412_v30 }
 0x18e   : > { %2761 = verf.f32 %v717_v42  ;;  %v808_v47 = vmul.f32 %v776_v43, %v680_v2  ;;  %v719_v48 = vmul.f32 0.70710677, %v3425_v32  ;;  %v686_v29 = vmul.f32 0.5, %v3417_v36 }
 0x18f   : > { %2763 = verf.f32 %v718_v22  ;;  %v720_v49 = vmul.f32 0.70710677, %v3429_v31  ;;  %v831_v50 = vpack.c.bf16 %v807_v45, %v805_v44  ;;  %v687_v2 = vmul.f32 0.5, %v3425_v32 }
 0x190   : > { %v2754_v26 = vpop.eup %2753  ;;  %2765 = verf.f32 %v719_v48  ;;  %v832_v53 = vpack.c.bf16 %v808_v47, %v806_v24  ;;  %v688_v45 = vmul.f32 0.5, %v3429_v31 }
 0x191   : > { %v2756_v58 = vpop.eup %2755  ;;  %v646_v52 = vpop.f32.mrb[24].mxu0  ;;  %v777_v3 = vadd.f32 1.0, %v2754_v26  ;;  %2767 = verf.f32 %v720_v49 }
 0x192   : > { %v3434_v59 = vadd.f32 %v646_v52, %v3338_v9  ;;  %v648_v55 = vpop.f32.mrb[25].mxu0  ;;  %v2758_v56 = vpop.eup %2757  ;;  %v778_v7 = vadd.f32 1.0, %v2756_v58  ;;  %1139 = vmatprep.mubr.bf16.mxu1 %v832_v53 }
 0x193   : > { %v3438_v60 = vadd.f32 %v648_v55, %v3342_v10  ;;  %v650_v12 = vpop.f32.mrb[26].mxu0  ;;  %v2760_v13 = vpop.eup %2759  ;;  %v779_v16 = vadd.f32 1.0, %v2758_v56  ;;  %1140 = vmatmul.mubr.bf16.gmra.mrb[12].mxu1 %v831_v50  ;;  %v809_v57 = vmul.f32 %v777_v3, %v681_v4 }
 0x194   : > { %v721_v61 = vmul.f32 0.70710677, %v3434_v59  ;;  %v652_v17 = vpop.f32.mrb[27].mxu0  ;;  %v780_v18 = vadd.f32 1.0, %v2760_v13  ;;  %v651_v19 = vadd.f32 %v650_v12, %v3338_v9  ;;  %v810_v11 = vmul.f32 %v778_v7, %v682_v14 }
 0x195   : > { %v722_v54 = vmul.f32 0.70710677, %v3438_v60  ;;  %v811_v20 = vmul.f32 %v779_v16, %v683_v15  ;;  %v653_v21 = vadd.f32 %v652_v17, %v3342_v10  ;;  %v689_v7 = vmul.f32 0.5, %v3434_v59 }
 0x196   : > { %2769 = verf.f32 %v721_v61  ;;  %v812_v23 = vmul.f32 %v780_v18, %v684_v41  ;;  %v723_v51 = vmul.f32 0.70710677, %v651_v19  ;;  %v691_v12 = vmul.f32 0.5, %v651_v19 }
 0x197   : > { %2771 = verf.f32 %v722_v54  ;;  %v724_v27 = vmul.f32 0.70710677, %v653_v21  ;;  %v833_v28 = vpack.c.bf16 %v811_v20, %v809_v57  ;;  %v690_v13 = vmul.f32 0.5, %v3438_v60 }
 0x198   : > { %v2762_v25 = vpop.eup %2761  ;;  %2773 = verf.f32 %v723_v51  ;;  %v834_v33 = vpack.c.bf16 %v812_v23, %v810_v11  ;;  %v692_v14 = vmul.f32 0.5, %v653_v21 }
 0x199   : > { %v2764_v62 = vpop.eup %2763  ;;  %v656_v46 = vpop.f32.mrb[28].mxu0  ;;  %v781_v63 = vadd.f32 1.0, %v2762_v25  ;;  %2775 = verf.f32 %v724_v27 }
 0x19a   : > { %v657_v34 = vadd.f32 %v656_v46, %v3338_v9  ;;  %v658_v35 = vpop.f32.mrb[29].mxu0  ;;  %v2766_v37 = vpop.eup %2765  ;;  %v782_v1 = vadd.f32 1.0, %v2764_v62  ;;  %1149 = vmatprep.mubr.bf16.mxu1 %v834_v33 }
 0x19b   : > { %v659_v39 = vadd.f32 %v658_v35, %v3342_v10  ;;  %v660_v40 = vpop.f32.mrb[30].mxu0  ;;  %v2768_v42 = vpop.eup %2767  ;;  %v783_v43 = vadd.f32 1.0, %v2766_v37  ;;  %1150 = vmatmul.mubr.bf16.gmra.mrb[16].mxu1 %v833_v28  ;;  %v813_v48 = vmul.f32 %v781_v63, %v685_v38  ;;  %v2691_v38 = vld [vmem:[%s3862_s5 + $0x68] sm:$0xff]  }
 0x19c   : > { %v725_v22 = vmul.f32 0.70710677, %v657_v34  ;;  %v662_v44 = vpop.f32.mrb[31].mxu0  ;;  %v784_v24 = vadd.f32 1.0, %v2768_v42  ;;  %v661_v30 = vadd.f32 %v660_v40, %v3338_v9  ;;  %v814_v50 = vmul.f32 %v782_v1, %v686_v29  ;;  %2438 = vmatprep.subr.bf16.mxu0 %v2691_v38  ;;  %2497 = vmatprep.subr.bf16.mxu1 %v2691_v38  ;;  %v2693_v1 = vld [vmem:[%s3862_s5 + $0x70] sm:$0xff]   ;;  %v2695_v40 = vld [vmem:[%s3862_s5 + $0x78] sm:$0xff]  }
 0x19d   : > { %v726_v47 = vmul.f32 0.70710677, %v659_v39  ;;  %v815_v26 = vmul.f32 %v783_v43, %v687_v2  ;;  %v663_v49 = vadd.f32 %v662_v44, %v3342_v10  ;;  %v693_v19 = vmul.f32 0.5, %v657_v34  ;;  %v2692_v34 = vld [vmem:[%s3862_s5 + $0x28] sm:$0xff]   ;;  %v2696_v42 = vld [vmem:[%s3862_s5 + $0x38] sm:$0xff]  }
 0x19e   : > { %2777 = verf.f32 %v725_v22  ;;  %v816_v58 = vmul.f32 %v784_v24, %v688_v45  ;;  %v727_v36 = vmul.f32 0.70710677, %v661_v30  ;;  %v695_v25 = vmul.f32 0.5, %v661_v30  ;;  %2439 = vmatpush3.bf16.msra.mxu0 %v2692_v34  ;;  %2505 = vmatpush3.bf16.msra.mxu1 %v2692_v34  ;;  %v905_v29 = vld [vmem:[%s3861_s4] sm:$0x3] }
 0x19f   : > { %2779 = verf.f32 %v726_v47  ;;  %v728_v52 = vmul.f32 0.70710677, %v663_v49  ;;  %v835_v53 = vpack.c.bf16 %v815_v26, %v813_v48  ;;  %v694_v60 = vmul.f32 0.5, %v659_v39  ;;  %v2694_v39 = vld [vmem:[%s3862_s5 + $0x30] sm:$0xff]   ;;  %2440 = vmatprep.subr.bf16.mxu0 %v2693_v1  ;;  %2498 = vmatprep.subr.bf16.mxu1 %v2693_v1 }
 0x1a0   : > { %v2770_v32 = vpop.eup %2769  ;;  %2781 = verf.f32 %v727_v36  ;;  %v836_v55 = vpack.c.bf16 %v816_v58, %v814_v50  ;;  %v696_v21 = vmul.f32 0.5, %v663_v49  ;;  %v3480_v2 = vrot.slane %v905_v29, %v416_v6 }
 0x1a1   : > { %v2772_v3 = vpop.eup %2771  ;;  %v785_v31 = vadd.f32 1.0, %v2770_v32  ;;  %2783 = verf.f32 %v728_v52  ;;  %v3484_v43 = vrot.slane %v905_v29, %v420_v8 }
 0x1a2   : > { %v2774_v56 = vpop.eup %2773  ;;  %v786_v4 = vadd.f32 1.0, %v2772_v3  ;;  %1159 = vmatprep.mubr.bf16.mxu1 %v836_v55  ;;  %2441 = vmatpush3.bf16.msra.mxu0 %v2694_v39 }
 0x1a3   : > { %v2776_v9 = vpop.eup %2775  ;;  %v787_v10 = vadd.f32 1.0, %v2774_v56  ;;  %1160 = vmatmul.mubr.bf16.gmra.mrb[20].mxu1 %v835_v53  ;;  %v817_v16 = vmul.f32 %v785_v31, %v689_v7  ;;  %2442 = vmatprep.subr.bf16.mxu0 %v2695_v40 }
 0x1a4   : > { %v788_v15 = vadd.f32 1.0, %v2776_v9  ;;  %v818_v17 = vmul.f32 %v786_v4, %v690_v13  ;;  %2506 = vmatpush3.bf16.msra.mxu1 %v2694_v39 }
 0x1a5   : > { %v819_v61 = vmul.f32 %v787_v10, %v691_v12  ;;  %2499 = vmatprep.subr.bf16.mxu1 %v2695_v40 }
 0x1a6   : > { %v820_v41 = vmul.f32 %v788_v15, %v692_v14  ;;  %2443 = vmatpush3.bf16.msra.mxu0 %v2696_v42 }
 0x1a7   : > { %v837_v54 = vpack.c.bf16 %v819_v61, %v817_v16 }
 0x1a8   : > { %v2778_v18 = vpop.eup %2777  ;;  %v838_v20 = vpack.c.bf16 %v820_v41, %v818_v17  ;;  %2507 = vmatpush3.bf16.msra.mxu1 %v2696_v42 }
 0x1a9   : > { %v2780_v57 = vpop.eup %2779  ;;  %v789_v11 = vadd.f32 1.0, %v2778_v18 }
 0x1aa   : > { %v2782_v23 = vpop.eup %2781  ;;  %v790_v51 = vadd.f32 1.0, %v2780_v57  ;;  %1169 = vmatprep.mubr.bf16.mxu1 %v838_v20 }
 0x1ab   : > { %v2784_v59 = vpop.eup %2783  ;;  %v791_v27 = vadd.f32 1.0, %v2782_v23  ;;  %1170 = vmatmul.mubr.bf16.gmra.mrb[24].mxu1 %v837_v54  ;;  %v821_v62 = vmul.f32 %v789_v11, %v693_v19 }
 0x1ac   : > { %v792_v28 = vadd.f32 1.0, %v2784_v59  ;;  %v822_v33 = vmul.f32 %v790_v51, %v694_v60 }
 0x1ad   : > { %v823_v46 = vmul.f32 %v791_v27, %v695_v25 }
 0x1ae   : > { %v824_v63 = vmul.f32 %v792_v28, %v696_v21 }
 0x1af   : > { %v839_v35 = vpack.c.bf16 %v823_v46, %v821_v62 }
 0x1b0   : > { %v840_v37 = vpack.c.bf16 %v824_v63, %v822_v33 }
 0x1b2   : > { %1179 = vmatprep.mubr.bf16.mxu1 %v840_v37 }
 0x1b3   : > { %1180 = vmatmul.mubr.bf16.gmra.mrb[28].mxu1 %v839_v35 }
 0x24e   : > { %v1111_v22 = vpop.f32.mrb[0].mxu1 }
 0x24f   : > { %v1112_v44 = vadd.f32 %v1111_v22, %v3480_v2  ;;  %v1113_v45 = vpop.f32.mrb[1].mxu1 }
 0x250   : > { %v1114_v24 = vadd.f32 %v1113_v45, %v3484_v43  ;;  %v1115_v47 = vpop.f32.mrb[2].mxu1 }
 0x251   : > { %v1222_v30 = vmul.f32 0.70710677, %v1112_v44  ;;  %v1116_v48 = vadd.f32 %v1115_v47, %v3480_v2  ;;  %v1117_v26 = vpop.f32.mrb[3].mxu1  ;;  %v1190_v41 = vmul.f32 0.5, %v1112_v44 }
 0x252   : > { %v1223_v49 = vmul.f32 0.70710677, %v1114_v24  ;;  %v1118_v50 = vadd.f32 %v1117_v26, %v3484_v43  ;;  %v1191_v11 = vmul.f32 0.5, %v1114_v24 }
 0x253   : > { %2785 = verf.f32 %v1222_v30  ;;  %v1224_v6 = vmul.f32 0.70710677, %v1116_v48  ;;  %v1192_v18 = vmul.f32 0.5, %v1116_v48 }
 0x254   : > { %2787 = verf.f32 %v1223_v49  ;;  %v1225_v5 = vmul.f32 0.70710677, %v1118_v50  ;;  %v1193_v23 = vmul.f32 0.5, %v1118_v50 }
 0x255   : > { %2789 = verf.f32 %v1224_v6 }
 0x256   : > { %2791 = verf.f32 %v1225_v5  ;;  %v1121_v8 = vpop.f32.mrb[4].mxu1 }
 0x257   : > { %v1122_v58 = vadd.f32 %v1121_v8, %v3480_v2  ;;  %v1123_v36 = vpop.f32.mrb[5].mxu1 }
 0x258   : > { %v1124_v32 = vadd.f32 %v1123_v36, %v3484_v43  ;;  %v1125_v52 = vpop.f32.mrb[6].mxu1 }
 0x259   : > { %v1226_v53 = vmul.f32 0.70710677, %v1122_v58  ;;  %v1126_v3 = vadd.f32 %v1125_v52, %v3480_v2  ;;  %v1127_v55 = vpop.f32.mrb[7].mxu1  ;;  %v1194_v45 = vmul.f32 0.5, %v1122_v58 }
 0x25a   : > { %v1227_v31 = vmul.f32 0.70710677, %v1124_v32  ;;  %v1128_v56 = vadd.f32 %v1127_v55, %v3484_v43  ;;  %v1195_v26 = vmul.f32 0.5, %v1124_v32 }
 0x25b   : > { %2793 = verf.f32 %v1226_v53  ;;  %v1228_v4 = vmul.f32 0.70710677, %v1126_v3  ;;  %v1196_v24 = vmul.f32 0.5, %v1126_v3 }
 0x25c   : > { %2795 = verf.f32 %v1227_v31  ;;  %v1229_v9 = vmul.f32 0.70710677, %v1128_v56  ;;  %v1197_v49 = vmul.f32 0.5, %v1128_v56 }
 0x25d   : > { %v2786_v7 = vpop.eup %2785  ;;  %2797 = verf.f32 %v1228_v4 }
 0x25e   : > { %v2788_v12 = vpop.eup %2787  ;;  %v1286_v10 = vadd.f32 1.0, %v2786_v7  ;;  %2799 = verf.f32 %v1229_v9  ;;  %v1131_v13 = vpop.f32.mrb[8].mxu1 }
 0x25f   : > { %v2790_v14 = vpop.eup %2789  ;;  %v1287_v15 = vadd.f32 1.0, %v2788_v12  ;;  %v3495_v16 = vadd.f32 %v1131_v13, %v3480_v2  ;;  %v1133_v61 = vpop.f32.mrb[9].mxu1 }
 0x260   : > { %v2792_v17 = vpop.eup %2791  ;;  %v1288_v54 = vadd.f32 1.0, %v2790_v14  ;;  %v3498_v57 = vadd.f32 %v1133_v61, %v3484_v43  ;;  %v1135_v20 = vpop.f32.mrb[10].mxu1  ;;  %v1318_v25 = vmul.f32 %v1286_v10, %v1190_v41 }
 0x261   : > { %v1289_v51 = vadd.f32 1.0, %v2792_v17  ;;  %v1230_v59 = vmul.f32 0.70710677, %v3495_v16  ;;  %v1137_v19 = vpop.f32.mrb[11].mxu1  ;;  %v1136_v21 = vadd.f32 %v1135_v20, %v3480_v2  ;;  %v1319_v28 = vmul.f32 %v1287_v15, %v1191_v11 }
 0x262   : > { %v1320_v27 = vmul.f32 %v1288_v54, %v1192_v18  ;;  %v1231_v60 = vmul.f32 0.70710677, %v3498_v57  ;;  %v1138_v46 = vadd.f32 %v1137_v19, %v3484_v43  ;;  %v1198_v61 = vmul.f32 0.5, %v3495_v16 }
 0x263   : > { %v1321_v62 = vmul.f32 %v1289_v51, %v1193_v23  ;;  %2801 = verf.f32 %v1230_v59  ;;  %v1232_v63 = vmul.f32 0.70710677, %v1136_v21  ;;  %v1199_v20 = vmul.f32 0.5, %v3498_v57 }
 0x264   : > { %v1350_v33 = vpack.c.bf16 %v1320_v27, %v1318_v25  ;;  %2803 = verf.f32 %v1231_v60  ;;  %v1233_v37 = vmul.f32 0.70710677, %v1138_v46  ;;  %v1200_v11 = vmul.f32 0.5, %v1136_v21 }
 0x265   : > { %v2794_v35 = vpop.eup %2793  ;;  %v1351_v38 = vpack.c.bf16 %v1321_v62, %v1319_v28  ;;  %2805 = verf.f32 %v1232_v63  ;;  %v1201_v19 = vmul.f32 0.5, %v1138_v46 }
 0x266   : > { %v2796_v34 = vpop.eup %2795  ;;  %v1290_v1 = vadd.f32 1.0, %v2794_v35  ;;  %v1141_v39 = vpop.f32.mrb[12].mxu1  ;;  %2807 = verf.f32 %v1233_v37 }
 0x267   : > { %v2798_v40 = vpop.eup %2797  ;;  %v1291_v42 = vadd.f32 1.0, %v2796_v34  ;;  %v3505_v29 = vadd.f32 %v1141_v39, %v3480_v2  ;;  %v1143_v22 = vpop.f32.mrb[13].mxu1  ;;  %1565 = vmatprep.mubr.bf16.mxu0 %v1351_v38 }
 0x268   : > { %v2800_v44 = vpop.eup %2799  ;;  %v1292_v47 = vadd.f32 1.0, %v2798_v40  ;;  %v3508_v30 = vadd.f32 %v1143_v22, %v3484_v43  ;;  %v1145_v48 = vpop.f32.mrb[14].mxu1  ;;  %1566 = vmatmul.mubr.bf16.vlgmr.msra.gmra.mrb[32].mxu0 %v1350_v33  ;;  %v1322_v8 = vmul.f32 %v1290_v1, %v1194_v45 }
 0x269   : > { %v1293_v50 = vadd.f32 1.0, %v2800_v44  ;;  %v1234_v6 = vmul.f32 0.70710677, %v3505_v29  ;;  %v1147_v5 = vpop.f32.mrb[15].mxu1  ;;  %v1146_v53 = vadd.f32 %v1145_v48, %v3480_v2  ;;  %v1323_v58 = vmul.f32 %v1291_v42, %v1195_v26 }
 0x26a   : > { %v1324_v36 = vmul.f32 %v1292_v47, %v1196_v24  ;;  %v1235_v52 = vmul.f32 0.70710677, %v3508_v30  ;;  %v1148_v55 = vadd.f32 %v1147_v5, %v3484_v43  ;;  %v1202_v22 = vmul.f32 0.5, %v3505_v29 }
 0x26b   : > { %v1325_v3 = vmul.f32 %v1293_v50, %v1197_v49  ;;  %2809 = verf.f32 %v1234_v6  ;;  %v1236_v31 = vmul.f32 0.70710677, %v1146_v53  ;;  %v1203_v48 = vmul.f32 0.5, %v3508_v30 }
 0x26c   : > { %2811 = verf.f32 %v1235_v52  ;;  %v1352_v4 = vpack.c.bf16 %v1324_v36, %v1322_v8  ;;  %v1237_v56 = vmul.f32 0.70710677, %v1148_v55  ;;  %v1204_v26 = vmul.f32 0.5, %v1146_v53 }
 0x26d   : > { %v2802_v32 = vpop.eup %2801  ;;  %v1353_v9 = vpack.c.bf16 %v1325_v3, %v1323_v58  ;;  %2813 = verf.f32 %v1236_v31  ;;  %v1205_v5 = vmul.f32 0.5, %v1148_v55 }
 0x26e   : > { %v2804_v7 = vpop.eup %2803  ;;  %v1151_v12 = vpop.f32.mrb[16].mxu1  ;;  %v1294_v10 = vadd.f32 1.0, %v2802_v32  ;;  %2815 = verf.f32 %v1237_v56 }
 0x26f   : > { %v3515_v13 = vadd.f32 %v1151_v12, %v3480_v2  ;;  %v1153_v14 = vpop.f32.mrb[17].mxu1  ;;  %1573 = vmatprep.mubr.bf16.mxu0 %v1353_v9  ;;  %v2806_v15 = vpop.eup %2805  ;;  %v1295_v17 = vadd.f32 1.0, %v2804_v7 }
 0x270   : > { %v3519_v41 = vadd.f32 %v1153_v14, %v3484_v43  ;;  %v1155_v18 = vpop.f32.mrb[18].mxu1  ;;  %1574 = vmatmul.mubr.bf16.gmra.mrb[36].mxu0 %v1352_v4  ;;  %v2808_v54 = vpop.eup %2807  ;;  %v1296_v23 = vadd.f32 1.0, %v2806_v15  ;;  %v1326_v60 = vmul.f32 %v1294_v10, %v1198_v61 }
 0x271   : > { %v1238_v51 = vmul.f32 0.70710677, %v3515_v13  ;;  %v1157_v59 = vpop.f32.mrb[19].mxu1  ;;  %v1297_v25 = vadd.f32 1.0, %v2808_v54  ;;  %v3525_v16 = vadd.f32 %v1155_v18, %v3480_v2  ;;  %v1327_v33 = vmul.f32 %v1295_v17, %v1199_v20 }
 0x272   : > { %v1239_v27 = vmul.f32 0.70710677, %v3519_v41  ;;  %v1328_v28 = vmul.f32 %v1296_v23, %v1200_v11  ;;  %v3528_v62 = vadd.f32 %v1157_v59, %v3484_v43  ;;  %v1206_v61 = vmul.f32 0.5, %v3515_v13 }
 0x273   : > { %2817 = verf.f32 %v1238_v51  ;;  %v1329_v57 = vmul.f32 %v1297_v25, %v1201_v19  ;;  %v1240_v21 = vmul.f32 0.70710677, %v3525_v16  ;;  %v1207_v11 = vmul.f32 0.5, %v3519_v41 }
 0x274   : > { %2819 = verf.f32 %v1239_v27  ;;  %v1241_v46 = vmul.f32 0.70710677, %v3528_v62  ;;  %v1354_v35 = vpack.c.bf16 %v1328_v28, %v1326_v60  ;;  %v1208_v23 = vmul.f32 0.5, %v3525_v16 }
 0x275   : > { %v2810_v63 = vpop.eup %2809  ;;  %2821 = verf.f32 %v1240_v21  ;;  %v1355_v34 = vpack.c.bf16 %v1329_v57, %v1327_v33  ;;  %v1209_v25 = vmul.f32 0.5, %v3528_v62 }
 0x276   : > { %v2812_v37 = vpop.eup %2811  ;;  %v1161_v38 = vpop.f32.mrb[20].mxu1  ;;  %v1298_v1 = vadd.f32 1.0, %v2810_v63  ;;  %2823 = verf.f32 %v1241_v46 }
 0x277   : > { %v3533_v39 = vadd.f32 %v1161_v38, %v3480_v2  ;;  %v1163_v40 = vpop.f32.mrb[21].mxu1  ;;  %v2814_v42 = vpop.eup %2813  ;;  %v1299_v44 = vadd.f32 1.0, %v2812_v37  ;;  %1581 = vmatprep.mubr.bf16.mxu0 %v1355_v34 }
 0x278   : > { %v3537_v45 = vadd.f32 %v1163_v40, %v3484_v43  ;;  %v1165_v24 = vpop.f32.mrb[22].mxu1  ;;  %v2816_v47 = vpop.eup %2815  ;;  %v1300_v49 = vadd.f32 1.0, %v2814_v42  ;;  %1582 = vmatmul.mubr.bf16.gmra.mrb[40].mxu0 %v1354_v35  ;;  %v1330_v52 = vmul.f32 %v1298_v1, %v1202_v22 }
 0x279   : > { %v1242_v50 = vmul.f32 0.70710677, %v3533_v39  ;;  %v1167_v6 = vpop.f32.mrb[23].mxu1  ;;  %v1301_v8 = vadd.f32 1.0, %v2816_v47  ;;  %v3543_v29 = vadd.f32 %v1165_v24, %v3480_v2  ;;  %v1331_v30 = vmul.f32 %v1299_v44, %v1203_v48 }
 0x27a   : > { %v1243_v36 = vmul.f32 0.70710677, %v3537_v45  ;;  %v1332_v58 = vmul.f32 %v1300_v49, %v1204_v26  ;;  %v3546_v3 = vadd.f32 %v1167_v6, %v3484_v43  ;;  %v1210_v22 = vmul.f32 0.5, %v3533_v39 }
 0x27b   : > { %2825 = verf.f32 %v1242_v50  ;;  %v1333_v53 = vmul.f32 %v1301_v8, %v1205_v5  ;;  %v1244_v31 = vmul.f32 0.70710677, %v3543_v29  ;;  %v1211_v26 = vmul.f32 0.5, %v3537_v45 }
 0x27c   : > { %2827 = verf.f32 %v1243_v36  ;;  %v1245_v55 = vmul.f32 0.70710677, %v3546_v3  ;;  %v1356_v32 = vpack.c.bf16 %v1332_v58, %v1330_v52  ;;  %v1212_v49 = vmul.f32 0.5, %v3543_v29 }
 0x27d   : > { %v2818_v4 = vpop.eup %2817  ;;  %2829 = verf.f32 %v1244_v31  ;;  %v1357_v7 = vpack.c.bf16 %v1333_v53, %v1331_v30  ;;  %v1213_v8 = vmul.f32 0.5, %v3546_v3 }
 0x27e   : > { %v2820_v56 = vpop.eup %2819  ;;  %v1171_v9 = vpop.f32.mrb[24].mxu1  ;;  %v1302_v12 = vadd.f32 1.0, %v2818_v4  ;;  %2831 = verf.f32 %v1245_v55 }
 0x27f   : > { %v3551_v10 = vadd.f32 %v1171_v9, %v3480_v2  ;;  %v1173_v14 = vpop.f32.mrb[25].mxu1  ;;  %v2822_v15 = vpop.eup %2821  ;;  %v1303_v17 = vadd.f32 1.0, %v2820_v56  ;;  %1589 = vmatprep.mubr.bf16.mxu0 %v1357_v7 }
 0x280   : > { %v3555_v18 = vadd.f32 %v1173_v14, %v3484_v43  ;;  %v1175_v54 = vpop.f32.mrb[26].mxu1  ;;  %v2824_v20 = vpop.eup %2823  ;;  %v1304_v51 = vadd.f32 1.0, %v2822_v15  ;;  %1590 = vmatmul.mubr.bf16.gmra.mrb[44].mxu0 %v1356_v32  ;;  %v1334_v28 = vmul.f32 %v1302_v12, %v1206_v61 }
 0x281   : > { %v1246_v59 = vmul.f32 0.70710677, %v3551_v10  ;;  %v1177_v19 = vpop.f32.mrb[27].mxu1  ;;  %v1305_v27 = vadd.f32 1.0, %v2824_v20  ;;  %v1176_v60 = vadd.f32 %v1175_v54, %v3480_v2  ;;  %v1335_v41 = vmul.f32 %v1303_v17, %v1207_v11 }
 0x282   : > { %v1247_v13 = vmul.f32 0.70710677, %v3555_v18  ;;  %v1336_v33 = vmul.f32 %v1304_v51, %v1208_v23  ;;  %v1178_v57 = vadd.f32 %v1177_v19, %v3484_v43  ;;  %v1214_v14 = vmul.f32 0.5, %v3551_v10 }
 0x283   : > { %2833 = verf.f32 %v1246_v59  ;;  %v1337_v21 = vmul.f32 %v1305_v27, %v1209_v25  ;;  %v1248_v16 = vmul.f32 0.70710677, %v1176_v60  ;;  %v1216_v15 = vmul.f32 0.5, %v1176_v60 }
 0x284   : > { %2835 = verf.f32 %v1247_v13  ;;  %v1249_v46 = vmul.f32 0.70710677, %v1178_v57  ;;  %v1358_v35 = vpack.c.bf16 %v1336_v33, %v1334_v28  ;;  %v1215_v61 = vmul.f32 0.5, %v3555_v18 }
 0x285   : > { %v2826_v63 = vpop.eup %2825  ;;  %2837 = verf.f32 %v1248_v16  ;;  %v1359_v38 = vpack.c.bf16 %v1337_v21, %v1335_v41  ;;  %v1217_v17 = vmul.f32 0.5, %v1178_v57 }
 0x286   : > { %v2828_v37 = vpop.eup %2827  ;;  %v1181_v62 = vpop.f32.mrb[28].mxu1  ;;  %v1306_v34 = vadd.f32 1.0, %v2826_v63  ;;  %2839 = verf.f32 %v1249_v46 }
 0x287   : > { %v1182_v1 = vadd.f32 %v1181_v62, %v3480_v2  ;;  %v1183_v40 = vpop.f32.mrb[29].mxu1  ;;  %v2830_v42 = vpop.eup %2829  ;;  %v1307_v44 = vadd.f32 1.0, %v2828_v37  ;;  %1597 = vmatprep.mubr.bf16.mxu0 %v1359_v38 }
 0x288   : > { %v1184_v24 = vadd.f32 %v1183_v40, %v3484_v43  ;;  %v1185_v47 = vpop.f32.mrb[30].mxu1  ;;  %v2832_v48 = vpop.eup %2831  ;;  %v1308_v50 = vadd.f32 1.0, %v2830_v42  ;;  %1598 = vmatmul.mubr.bf16.gmra.mrb[48].mxu0 %v1358_v35  ;;  %v1338_v58 = vmul.f32 %v1306_v34, %v1210_v22  ;;  %v2697_v34 = vld [vmem:[#allocation10 + $0x8] ss:$16 sps:$4 sm:$0xff]   ;;  %v2699_v40 = vld [vmem:[#allocation10 + $0xc] ss:$16 sps:$4 sm:$0xff]  }
 0x289   : > { %v1250_v6 = vmul.f32 0.70710677, %v1182_v1  ;;  %v1187_v5 = vpop.f32.mrb[31].mxu1  ;;  %v1309_v36 = vadd.f32 1.0, %v2832_v48  ;;  %v1186_v39 = vadd.f32 %v1185_v47, %v3480_v2  ;;  %v1339_v31 = vmul.f32 %v1307_v44, %v1211_v26  ;;  %v2702_v42 = vld [vmem:[#allocation10 + $0x2c] ss:$16 sps:$4 sm:$0xff]   ;;  %2001 = vmatprep.subr.bf16.mxu0 %v2699_v40 }
 0x28a   : > { %v1251_v52 = vmul.f32 0.70710677, %v1184_v24  ;;  %v1340_v30 = vmul.f32 %v1308_v50, %v1212_v49  ;;  %v1188_v53 = vadd.f32 %v1187_v5, %v3484_v43  ;;  %v1218_v33 = vmul.f32 0.5, %v1182_v1  ;;  %2002 = vmatpush1.bf16.msra.mxu0 %v2697_v34  ;;  %v2700_v1 = vld [vmem:[#allocation10 + $0x28] ss:$16 sps:$4 sm:$0xff]  }
 0x28b   : > { %2841 = verf.f32 %v1250_v6  ;;  %v1341_v4 = vmul.f32 %v1309_v36, %v1213_v8  ;;  %v1252_v45 = vmul.f32 0.70710677, %v1186_v39  ;;  %v1220_v41 = vmul.f32 0.5, %v1186_v39  ;;  %2003 = vmatprep.subr.bf16.mxu0 %v2702_v42  ;;  %v3579_v44 = vld [vmem:[%s3863_s6] ss:$0 sm:$0xff] }
 0x28c   : > { %2843 = verf.f32 %v1251_v52  ;;  %v1253_v55 = vmul.f32 0.70710677, %v1188_v53  ;;  %v1360_v32 = vpack.c.bf16 %v1340_v30, %v1338_v58  ;;  %v1219_v57 = vmul.f32 0.5, %v1184_v24  ;;  %v2711_v40 = vld [vmem:[#allocation10 + $0x24] ss:$16 sps:$4 sm:$0xff]  }
 0x28d   : > { %v2834_v29 = vpop.eup %2833  ;;  %2845 = verf.f32 %v1252_v45  ;;  %v1361_v9 = vpack.c.bf16 %v1341_v4, %v1339_v31  ;;  %v1221_v21 = vmul.f32 0.5, %v1188_v53  ;;  %v2709_v42 = vld [vmem:[#allocation10 + $0x20] ss:$16 sps:$4 sm:$0xff]  }
 0x28e   : > { %v2836_v56 = vpop.eup %2835  ;;  %v1310_v3 = vadd.f32 1.0, %v2834_v29  ;;  %2847 = verf.f32 %v1253_v55  ;;  %2004 = vmatpush1.bf16.msra.mxu0 %v2700_v1 }
 0x28f   : > { %v2838_v7 = vpop.eup %2837  ;;  %v1311_v12 = vadd.f32 1.0, %v2836_v56  ;;  %1605 = vmatprep.mubr.bf16.mxu0 %v1361_v9 }
 0x290   : > { %v2840_v2 = vpop.eup %2839  ;;  %v1312_v43 = vadd.f32 1.0, %v2838_v7  ;;  %1606 = vmatmul.mubr.bf16.gmra.mrb[52].mxu0 %v1360_v32  ;;  %v1342_v20 = vmul.f32 %v1310_v3, %v1214_v14 }
 0x291   : > { %v1313_v54 = vadd.f32 1.0, %v2840_v2  ;;  %2033 = vmatprep.mubr.bf16.mxu0 %v3060_v0  ;;  %v1343_v23 = vmul.f32 %v1311_v12, %v1215_v61 }
 0x292   : > { %v1344_v11 = vmul.f32 %v1312_v43, %v1216_v15 }
 0x293   : > { %v1345_v51 = vmul.f32 %v1313_v54, %v1217_v17 }
 0x294   : > { %v1362_v19 = vpack.c.bf16 %v1344_v11, %v1342_v20 }
 0x295   : > { %v2842_v59 = vpop.eup %2841  ;;  %v1363_v27 = vpack.c.bf16 %v1345_v51, %v1343_v23 }
 0x296   : > { %v2844_v25 = vpop.eup %2843  ;;  %v1314_v13 = vadd.f32 1.0, %v2842_v59 }
 0x297   : > { %v2846_v28 = vpop.eup %2845  ;;  %v1315_v10 = vadd.f32 1.0, %v2844_v25  ;;  %1613 = vmatprep.mubr.bf16.mxu1 %v1363_v27 }
 0x298   : > { %v2848_v60 = vpop.eup %2847  ;;  %v1316_v18 = vadd.f32 1.0, %v2846_v28  ;;  %1614 = vmatmul.mubr.bf16.vlgmr.msra.gmra.mrb[32].mxu1 %v1362_v19  ;;  %v1346_v63 = vmul.f32 %v1314_v13, %v1218_v33 }
 0x299   : > { %v1317_v16 = vadd.f32 1.0, %v2848_v60  ;;  %v1347_v35 = vmul.f32 %v1315_v10, %v1219_v57 }
 0x29a   : > { %v1348_v46 = vmul.f32 %v1316_v18, %v1220_v41 }
 0x29b   : > { %v1349_v37 = vmul.f32 %v1317_v16, %v1221_v21 }
 0x29c   : > { %v1364_v62 = vpack.c.bf16 %v1348_v46, %v1346_v63  ;;  %v2708_v63 = vld [vmem:[#allocation10 + $0x4] ss:$16 sps:$4 sm:$0xff]  }
 0x29d   : > { %v1365_v38 = vpack.c.bf16 %v1349_v37, %v1347_v35  ;;  %v2706_v35 = vld [vmem:[#allocation10] ss:$16 sps:$4 sm:$0xff]   ;;  %1888 = vmatprep.subr.bf16.mxu1 %v2708_v63 }
 0x29e   : > { %1889 = vmatpush1.bf16.msra.mxu1 %v2706_v35 }
 0x29f   : > { %1621 = vmatprep.mubr.bf16.mxu1 %v1365_v38  ;;  %1890 = vmatprep.subr.bf16.mxu1 %v2711_v40 }
 0x2a0   : > { %1622 = vmatmul.mubr.bf16.gmra.mrb[36].mxu1 %v1364_v62 }
 0x2a1   : > { %1920 = vmatprep.mubr.bf16.mxu1 %v3060_v0 }
 0x2a2   : > { %1891 = vmatpush1.bf16.msra.mxu1 %v2709_v42 }
 0x33b   : > { %v2444_v22 = vpop.f32.mrb[32].mxu0 }
 0x33c   : > { %v2445_v24 = vpop.f32.mrb[33].mxu0 }
 0x33d   : > { %v2446_v47 = vadd.f32 %v2445_v24, %v2444_v22  ;;  %v2447_v48 = vpop.f32.mrb[34].mxu0 }
 0x33e   : > { %v2448_v26 = vpop.f32.mrb[35].mxu0 }
 0x33f   : > { %v3582_v49 = vadd.f32 %v2446_v47, %v3579_v44  ;;  %v2449_v50 = vadd.f32 %v2448_v26, %v2447_v48 }
 0x341   : > { %v3585_v6 = vadd.f32 %v2449_v50, %v3579_v44  ;;  %v1630_v5 = vmul.f32 %v3582_v49, %v3582_v49 }
 0x343   : > { %v2450_v8 = vpop.f32.mrb[36].mxu0  ;;  %v1647_v36 = vsel %vm1646_vm0, %v1630_v5, 0.0  ;;  %v1631_v52 = vmul.f32 %v3585_v6, %v3585_v6  ;;  %v2705_v5 = vld [vmem:[#allocation10 + $0x4c] ss:$16 sps:$4 sm:$0xff]  }
 0x344   : > { %v2451_v39 = vpop.f32.mrb[37].mxu0  ;;  %1648 = vadd.xlane.f32.xlu0 %v1647_v36  ;;  %2005 = vmatprep.subr.bf16.mxu0 %v2705_v5 }
 0x345   : > { %v2452_v58 = vadd.f32 %v2451_v39, %v2450_v8  ;;  %v2453_v30 = vpop.f32.mrb[38].mxu0  ;;  %v1650_v45 = vsel %vm1646_vm0, %v1631_v52, 0.0  ;;  %v2717_v8 = vld [vmem:[#allocation10 + $0x44] ss:$16 sps:$4 sm:$0xff]   ;;  %v2703_v52 = vld [vmem:[#allocation10 + $0x48] ss:$16 sps:$4 sm:$0xff]  }
 0x346   : > { %v2454_v53 = vpop.f32.mrb[39].mxu0  ;;  %v2715_v39 = vld [vmem:[#allocation10 + $0x40] ss:$16 sps:$4 sm:$0xff]   ;;  %1892 = vmatprep.subr.bf16.mxu1 %v2717_v8  ;;  %2006 = vmatpush1.bf16.msra.mxu0 %v2703_v52 }
 0x347   : > { %v3593_v31 = vadd.f32 %v2452_v58, %v3579_v44  ;;  %v2455_v4 = vadd.f32 %v2454_v53, %v2453_v30  ;;  %1893 = vmatpush1.bf16.msra.mxu1 %v2715_v39 }
 0x348   : > { %1651 = vadd.xlane.f32.xlu0 %v1650_v45  ;;  %v2714_v45 = vld [vmem:[#allocation10 + $0x6c] ss:$16 sps:$4 sm:$0xff]  }
 0x349   : > { %v3597_v29 = vadd.f32 %v2455_v4, %v3579_v44  ;;  %v1632_v55 = vmul.f32 %v3593_v31, %v3593_v31  ;;  %2007 = vmatprep.subr.bf16.mxu0 %v2714_v45 }
 0x34b   : > { %v1653_v32 = vsel %vm1646_vm0, %v1632_v55, 0.0  ;;  %v1633_v56 = vmul.f32 %v3597_v29, %v3597_v29  ;;  %v2456_v9 = vpop.f32.mrb[40].mxu0  ;;  %v2720_v55 = vld [vmem:[#allocation10 + $0x64] ss:$16 sps:$4 sm:$0xff]  }
 0x34c   : > { %1654 = vadd.xlane.f32.xlu1 %v1653_v32  ;;  %v2457_v3 = vpop.f32.mrb[41].mxu0  ;;  %v2712_v32 = vld [vmem:[#allocation10 + $0x68] ss:$16 sps:$4 sm:$0xff]   ;;  %1894 = vmatprep.subr.bf16.mxu1 %v2720_v55 }
 0x34d   : > { %v2458_v7 = vadd.f32 %v2457_v3, %v2456_v9  ;;  %v2459_v12 = vpop.f32.mrb[42].mxu0  ;;  %v1656_v14 = vsel %vm1646_vm0, %v1633_v56, 0.0  ;;  %v2718_v56 = vld [vmem:[#allocation10 + $0x60] ss:$16 sps:$4 sm:$0xff]   ;;  %2008 = vmatpush1.bf16.msra.mxu0 %v2712_v32 }
 0x34e   : > { %v2460_v2 = vpop.f32.mrb[43].mxu0  ;;  %1895 = vmatpush1.bf16.msra.mxu1 %v2718_v56 }
 0x34f   : > { %v3606_v15 = vadd.f32 %v2458_v7, %v3579_v44  ;;  %v2461_v43 = vadd.f32 %v2460_v2, %v2459_v12 }
 0x350   : > { %1657 = vadd.xlane.f32.xlu1 %v1656_v14 }
 0x351   : > { %v3609_v61 = vadd.f32 %v2461_v43, %v3579_v44  ;;  %v1634_v17 = vmul.f32 %v3606_v15, %v3606_v15 }
 0x353   : > { %v2462_v54 = vpop.f32.mrb[44].mxu0  ;;  %v1659_v20 = vsel %vm1646_vm0, %v1634_v17, 0.0  ;;  %v1635_v11 = vmul.f32 %v3609_v61, %v3609_v61 }
 0x354   : > { %v2463_v23 = vpop.f32.mrb[45].mxu0  ;;  %1660 = vadd.xlane.f32.xlu0 %v1659_v20 }
 0x355   : > { %v2464_v51 = vadd.f32 %v2463_v23, %v2462_v54  ;;  %v2465_v59 = vpop.f32.mrb[46].mxu0  ;;  %v1662_v19 = vsel %vm1646_vm0, %v1635_v11, 0.0 }
 0x356   : > { %v2466_v25 = vpop.f32.mrb[47].mxu0  ;;  %1663 = vadd.xlane.f32.xlu1 %v1662_v19 }
 0x357   : > { %v3618_v27 = vadd.f32 %v2464_v51, %v3579_v44  ;;  %v2467_v13 = vadd.f32 %v2466_v25, %v2465_v59 }
 0x359   : > { %v3621_v28 = vadd.f32 %v2467_v13, %v3579_v44  ;;  %v1636_v10 = vmul.f32 %v3618_v27, %v3618_v27 }
 0x35b   : > { %v2468_v60 = vpop.f32.mrb[48].mxu0  ;;  %v1665_v33 = vsel %vm1646_vm0, %v1636_v10, 0.0  ;;  %v1637_v41 = vmul.f32 %v3621_v28, %v3621_v28 }
 0x35c   : > { %v2469_v18 = vpop.f32.mrb[49].mxu0  ;;  %1666 = vadd.xlane.f32.xlu0 %v1665_v33 }
 0x35d   : > { %v2470_v57 = vadd.f32 %v2469_v18, %v2468_v60  ;;  %v2471_v21 = vpop.f32.mrb[50].mxu0  ;;  %v1668_v16 = vsel %vm1646_vm0, %v1637_v41, 0.0 }
 0x35e   : > { %v2472_v46 = vpop.f32.mrb[51].mxu0  ;;  %1669 = vadd.xlane.f32.xlu1 %v1668_v16 }
 0x35f   : > { %v3630_v37 = vadd.f32 %v2470_v57, %v3579_v44  ;;  %v2473_v62 = vadd.f32 %v2472_v46, %v2471_v21 }
 0x361   : > { %v3633_v38 = vadd.f32 %v2473_v62, %v3579_v44  ;;  %v1638_v34 = vmul.f32 %v3630_v37, %v3630_v37 }
 0x363   : > { %v2474_v1 = vpop.f32.mrb[52].mxu0  ;;  %v1671_v22 = vsel %vm1646_vm0, %v1638_v34, 0.0  ;;  %v1639_v24 = vmul.f32 %v3633_v38, %v3633_v38 }
 0x364   : > { %v2475_v47 = vpop.f32.mrb[53].mxu0  ;;  %1672 = vadd.xlane.f32.xlu0 %v1671_v22 }
 0x365   : > { %v2476_v48 = vadd.f32 %v2475_v47, %v2474_v1  ;;  %v2477_v26 = vpop.f32.mrb[54].mxu0  ;;  %v1674_v50 = vsel %vm1646_vm0, %v1639_v24, 0.0 }
 0x366   : > { %v2478_v36 = vpop.f32.mrb[55].mxu0  ;;  %1675 = vadd.xlane.f32.xlu1 %v1674_v50 }
 0x367   : > { %v3642_v58 = vadd.f32 %v2476_v48, %v3579_v44  ;;  %v2479_v30 = vadd.f32 %v2478_v36, %v2477_v26 }
 0x369   : > { %v3645_v53 = vadd.f32 %v2479_v30, %v3579_v44  ;;  %v1640_v4 = vmul.f32 %v3642_v58, %v3642_v58 }
 0x36b   : > { %v2480_v9 = vpop.f32.mrb[32].mxu1  ;;  %v1677_v3 = vsel %vm1646_vm0, %v1640_v4, 0.0  ;;  %v1641_v7 = vmul.f32 %v3645_v53, %v3645_v53 }
 0x36c   : > { %v2481_v12 = vpop.f32.mrb[33].mxu1  ;;  %1678 = vadd.xlane.f32.xlu0 %v1677_v3 }
 0x36d   : > { %v2482_v2 = vadd.f32 %v2481_v12, %v2480_v9  ;;  %v2483_v14 = vpop.f32.mrb[34].mxu1  ;;  %v1680_v43 = vsel %vm1646_vm0, %v1641_v7, 0.0 }
 0x36e   : > { %v2484_v17 = vpop.f32.mrb[35].mxu1  ;;  %1681 = vadd.xlane.f32.xlu1 %v1680_v43 }
 0x36f   : > { %v3654_v54 = vadd.f32 %v2482_v2, %v3579_v44  ;;  %v2485_v20 = vadd.f32 %v2484_v17, %v2483_v14 }
 0x371   : > { %v3657_v11 = vadd.f32 %v2485_v20, %v3579_v44  ;;  %v1642_v23 = vmul.f32 %v3654_v54, %v3654_v54 }
 0x373   : > { %v2486_v51 = vpop.f32.mrb[36].mxu1  ;;  %v1683_v59 = vsel %vm1646_vm0, %v1642_v23, 0.0  ;;  %v1643_v19 = vmul.f32 %v3657_v11, %v3657_v11 }
 0x374   : > { %v2487_v25 = vpop.f32.mrb[37].mxu1  ;;  %1684 = vadd.xlane.f32.xlu0 %v1683_v59 }
 0x375   : > { %v2488_v13 = vadd.f32 %v2487_v25, %v2486_v51  ;;  %v2489_v10 = vpop.f32.mrb[38].mxu1  ;;  %v1686_v60 = vsel %vm1646_vm0, %v1643_v19, 0.0 }
 0x376   : > { %v2490_v33 = vpop.f32.mrb[39].mxu1  ;;  %1687 = vadd.xlane.f32.xlu1 %v1686_v60 }
 0x377   : > { %v3666_v41 = vadd.f32 %v2488_v13, %v3579_v44  ;;  %v2491_v18 = vadd.f32 %v2490_v33, %v2489_v10 }
 0x379   : > { %v3669_v57 = vadd.f32 %v2491_v18, %v3579_v44  ;;  %v1644_v21 = vmul.f32 %v3666_v41, %v3666_v41 }
 0x37b   : > { %v1689_v16 = vsel %vm1646_vm0, %v1644_v21, 0.0  ;;  %v1645_v63 = vmul.f32 %v3669_v57, %v3669_v57 }
 0x37c   : > { %1690 = vadd.xlane.f32.xlu0 %v1689_v16 }
 0x37d   : > { %v1692_v46 = vsel %vm1646_vm0, %v1645_v63, 0.0 }
 0x37e   : > { %1693 = vadd.xlane.f32.xlu1 %v1692_v46 }
 0x3d1   : > { %v1649_v35 = vpop.xlane.xlu0 %1648 }
 0x3d2   : > { %v1695_v62 = vmax.f32 %v1649_v35, 1e-24 }
 0x3d4   : > { %2849 = vrsqrt.f32 %v1695_v62 }
 0x3d5   : > { %v1652_v34 = vpop.xlane.xlu0 %1651 }
 0x3d6   : > { %v1696_v40 = vmax.f32 %v1652_v34, 1e-24 }
 0x3d8   : > { %2851 = vrsqrt.f32 %v1696_v40 }
 0x3d9   : > { %v1655_v44 = vpop.xlane.xlu1 %1654 }
 0x3da   : > { %v1697_v42 = vmax.f32 %v1655_v44, 1e-24 }
 0x3dc   : > { %2853 = vrsqrt.f32 %v1697_v42 }
 0x3dd   : > { %v1658_v1 = vpop.xlane.xlu1 %1657 }
 0x3de   : > { %v1698_v22 = vmax.f32 %v1658_v1, 1e-24  ;;  %v2850_v24 = vpop.eup %2849 }
 0x3df   : > { %v1727_v26 = vmul.f32 %v2850_v24, %v3582_v49 }
 0x3e0   : > { %2855 = vrsqrt.f32 %v1698_v22 }
 0x3e1   : > { %v1661_v48 = vpop.xlane.xlu0 %1660 }
 0x3e2   : > { %v2852_v47 = vpop.eup %2851  ;;  %v1699_v5 = vmax.f32 %v1661_v48, 1e-24 }
 0x3e3   : > { %v1728_v50 = vmul.f32 %v2852_v47, %v3585_v6  ;;  %v1664_v8 = vpop.xlane.xlu1 %1663 }
 0x3e4   : > { %2857 = vrsqrt.f32 %v1699_v5  ;;  %v1700_v52 = vmax.f32 %v1664_v8, 1e-24 }
 0x3e5   : > { %v1743_v36 = vpack.c.bf16 %v1728_v50, %v1727_v26 }
 0x3e6   : > { %2859 = vrsqrt.f32 %v1700_v52  ;;  %v2854_v39 = vpop.eup %2853 }
 0x3e7   : > { %1751 = vst.msk [vmem:[#allocation4] sm:$0xff] %vm1646_vm0, %v1743_v36  ;;  %v1729_v45 = vmul.f32 %v2854_v39, %v3593_v31 }
 0x3e9   : > { %v1667_v4 = vpop.xlane.xlu0 %1666 }
 0x3ea   : > { %v2856_v30 = vpop.eup %2855  ;;  %v1701_v32 = vmax.f32 %v1667_v4, 1e-24 }
 0x3eb   : > { %v1730_v55 = vmul.f32 %v2856_v30, %v3597_v29  ;;  %v1670_v56 = vpop.xlane.xlu1 %1669 }
 0x3ec   : > { %2861 = vrsqrt.f32 %v1701_v32  ;;  %v1702_v6 = vmax.f32 %v1670_v56, 1e-24 }
 0x3ed   : > { %v1744_v49 = vpack.c.bf16 %v1730_v55, %v1729_v45 }
 0x3ee   : > { %v1759_v9 = vld [vmem:[#allocation4] sm:$0xff]  ;;  %v2858_v3 = vpop.eup %2857  ;;  %2863 = vrsqrt.f32 %v1702_v6 }
 0x3ef   : > { %1752 = vst.msk [vmem:[#allocation4 + $0x8] sm:$0xff] %vm1646_vm0, %v1744_v49  ;;  %2404 = vmatmul.mubr.msk.bf16.vlgmr.msra.gmra.mrb[40].mxu1 %vm1646_vm0, %v1759_v9  ;;  %2412 = vmatmul.mubr.msk.bf16.vlgmr.msra.gmra.mrb[56].mxu0 %vm1646_vm0, %v1759_v9  ;;  %v1731_v29 = vmul.f32 %v2858_v3, %v3606_v15 }
 0x3f0   : > { %1930 = vmatprep.mubr.bf16.mxu1 %v3060_v0  ;;  %2043 = vmatprep.mubr.bf16.mxu0 %v3060_v0  ;;  %v2860_v31 = vpop.eup %2859 }
 0x3f1   : > { %v1732_v7 = vmul.f32 %v2860_v31, %v3609_v61  ;;  %v1673_v12 = vpop.xlane.xlu0 %1672 }
 0x3f2   : > { %v1703_v2 = vmax.f32 %v1673_v12, 1e-24 }
 0x3f3   : > { %v1745_v14 = vpack.c.bf16 %v1732_v7, %v1731_v29  ;;  %v1676_v43 = vpop.xlane.xlu1 %1675 }
 0x3f4   : > { %2865 = vrsqrt.f32 %v1703_v2  ;;  %v1704_v17 = vmax.f32 %v1676_v43, 1e-24 }
 0x3f5   : > { %1753 = vst.msk [vmem:[#allocation4 + $0x10] sm:$0xff] %vm1646_vm0, %v1745_v14 }
 0x3f6   : > { %v1760_v20 = vld [vmem:[#allocation4 + $0x8] sm:$0xff]  ;;  %v2862_v23 = vpop.eup %2861  ;;  %2867 = vrsqrt.f32 %v1704_v17 }
 0x3f7   : > { %2405 = vmatmul.mubr.msk.bf16.gmra.mrb[44].mxu1 %vm1646_vm0, %v1760_v20  ;;  %2413 = vmatmul.mubr.msk.bf16.gmra.mrb[60].mxu0 %vm1646_vm0, %v1760_v20  ;;  %v1733_v61 = vmul.f32 %v2862_v23, %v3618_v27 }
 0x3f8   : > { %1940 = vmatprep.mubr.bf16.mxu1 %v3060_v0  ;;  %2053 = vmatprep.mubr.bf16.mxu0 %v3060_v0  ;;  %v2864_v15 = vpop.eup %2863 }
 0x3f9   : > { %v1734_v51 = vmul.f32 %v2864_v15, %v3621_v28  ;;  %v1679_v59 = vpop.xlane.xlu0 %1678 }
 0x3fa   : > { %v1705_v19 = vmax.f32 %v1679_v59, 1e-24 }
 0x3fb   : > { %v1746_v25 = vpack.c.bf16 %v1734_v51, %v1733_v61  ;;  %v1682_v13 = vpop.xlane.xlu1 %1681 }
 0x3fc   : > { %2869 = vrsqrt.f32 %v1705_v19  ;;  %v1706_v10 = vmax.f32 %v1682_v13, 1e-24  ;;  %v1761_v60 = vld [vmem:[#allocation4 + $0x10] sm:$0xff] }
 0x3fd   : > { %1754 = vst.msk [vmem:[#allocation4 + $0x18] sm:$0xff] %vm1646_vm0, %v1746_v25 }
 0x3fe   : > { %v2866_v33 = vpop.eup %2865  ;;  %2871 = vrsqrt.f32 %v1706_v10 }
 0x3ff   : > { %2406 = vmatmul.mubr.msk.bf16.gmra.mrb[48].mxu1 %vm1646_vm0, %v1761_v60  ;;  %2414 = vmatmul.mubr.msk.bf16.gmra.mrb[64].mxu0 %vm1646_vm0, %v1761_v60  ;;  %v1735_v28 = vmul.f32 %v2866_v33, %v3630_v37 }
 0x400   : > { %1950 = vmatprep.mubr.bf16.mxu1 %v3060_v0  ;;  %2063 = vmatprep.mubr.bf16.mxu0 %v3060_v0  ;;  %v2868_v27 = vpop.eup %2867 }
 0x401   : > { %v1736_v18 = vmul.f32 %v2868_v27, %v3633_v38  ;;  %v1685_v21 = vpop.xlane.xlu0 %1684 }
 0x402   : > { %v1707_v16 = vmax.f32 %v1685_v21, 1e-24 }
 0x403   : > { %v1747_v63 = vpack.c.bf16 %v1736_v18, %v1735_v28  ;;  %v1688_v46 = vpop.xlane.xlu1 %1687 }
 0x404   : > { %2873 = vrsqrt.f32 %v1707_v16  ;;  %v1708_v35 = vmax.f32 %v1688_v46, 1e-24  ;;  %v1762_v62 = vld [vmem:[#allocation4 + $0x18] sm:$0xff] }
 0x405   : > { %1755 = vst.msk [vmem:[#allocation4 + $0x20] sm:$0xff] %vm1646_vm0, %v1747_v63 }
 0x406   : > { %v2870_v34 = vpop.eup %2869  ;;  %2875 = vrsqrt.f32 %v1708_v35 }
 0x407   : > { %2407 = vmatmul.mubr.msk.bf16.gmra.mrb[52].mxu1 %vm1646_vm0, %v1762_v62  ;;  %2415 = vmatmul.mubr.msk.bf16.gmra.mrb[68].mxu0 %vm1646_vm0, %v1762_v62  ;;  %v1737_v38 = vmul.f32 %v2870_v34, %v3642_v58 }
 0x408   : > { %1960 = vmatprep.mubr.bf16.mxu1 %v3060_v0  ;;  %2073 = vmatprep.mubr.bf16.mxu0 %v3060_v0  ;;  %v2872_v37 = vpop.eup %2871 }
 0x409   : > { %v1738_v40 = vmul.f32 %v2872_v37, %v3645_v53  ;;  %v1691_v44 = vpop.xlane.xlu0 %1690 }
 0x40a   : > { %v1709_v42 = vmax.f32 %v1691_v44, 1e-24 }
 0x40b   : > { %v1748_v1 = vpack.c.bf16 %v1738_v40, %v1737_v38  ;;  %v1694_v22 = vpop.xlane.xlu1 %1693 }
 0x40c   : > { %2877 = vrsqrt.f32 %v1709_v42  ;;  %v1710_v24 = vmax.f32 %v1694_v22, 1e-24  ;;  %v1763_v47 = vld [vmem:[#allocation4 + $0x20] sm:$0xff] }
 0x40d   : > { %1756 = vst.msk [vmem:[#allocation4 + $0x28] sm:$0xff] %vm1646_vm0, %v1748_v1 }
 0x40e   : > { %v2874_v48 = vpop.eup %2873  ;;  %2879 = vrsqrt.f32 %v1710_v24 }
 0x40f   : > { %2408 = vmatmul.mubr.msk.bf16.gmra.mrb[56].mxu1 %vm1646_vm0, %v1763_v47  ;;  %2416 = vmatmul.mubr.msk.bf16.gmra.mrb[72].mxu0 %vm1646_vm0, %v1763_v47  ;;  %v1739_v53 = vmul.f32 %v2874_v48, %v3654_v54 }
 0x410   : > { %1970 = vmatprep.mubr.bf16.mxu1 %v3060_v0  ;;  %2083 = vmatprep.mubr.bf16.mxu0 %v3060_v0  ;;  %v2876_v58 = vpop.eup %2875 }
 0x411   : > { %v1740_v26 = vmul.f32 %v2876_v58, %v3657_v11 }
 0x413   : > { %v1749_v50 = vpack.c.bf16 %v1740_v26, %v1739_v53 }
 0x414   : > { %v1764_v5 = vld [vmem:[#allocation4 + $0x28] sm:$0xff] }
 0x415   : > { %1757 = vst.msk [vmem:[#allocation4 + $0x30] sm:$0xff] %vm1646_vm0, %v1749_v50 }
 0x416   : > { %v2878_v8 = vpop.eup %2877 }
 0x417   : > { %2409 = vmatmul.mubr.msk.bf16.gmra.mrb[60].mxu1 %vm1646_vm0, %v1764_v5  ;;  %2417 = vmatmul.mubr.msk.bf16.gmra.mrb[76].mxu0 %vm1646_vm0, %v1764_v5  ;;  %v1741_v54 = vmul.f32 %v2878_v8, %v3666_v41 }
 0x418   : > { %1980 = vmatprep.mubr.bf16.mxu1 %v3060_v0  ;;  %2093 = vmatprep.mubr.bf16.mxu0 %v3060_v0  ;;  %v2880_v36 = vpop.eup %2879 }
 0x419   : > { %v1742_v11 = vmul.f32 %v2880_v36, %v3669_v57 }
 0x41b   : > { %v1750_v52 = vpack.c.bf16 %v1742_v11, %v1741_v54 }
 0x41c   : > { %v1765_v39 = vld [vmem:[#allocation4 + $0x30] sm:$0xff] }
 0x41d   : > { %1758 = vst.msk [vmem:[#allocation4 + $0x38] sm:$0xff] %vm1646_vm0, %v1750_v52 }
 0x41f   : > { %2410 = vmatmul.mubr.msk.bf16.gmra.mrb[64].mxu1 %vm1646_vm0, %v1765_v39  ;;  %2418 = vmatmul.mubr.msk.bf16.gmra.mrb[80].mxu0 %vm1646_vm0, %v1765_v39 }
 0x420   : > { %1990 = vmatprep.mubr.bf16.mxu1 %v3060_v0  ;;  %2103 = vmatprep.mubr.bf16.mxu0 %v3060_v0 }
 0x424   : > { %v1766_v30 = vld [vmem:[#allocation4 + $0x38] sm:$0xff] }
 0x427   : > { %2411 = vmatmul.mubr.msk.bf16.gmra.mrb[68].mxu1 %vm1646_vm0, %v1766_v30  ;;  %2419 = vmatmul.mubr.msk.bf16.gmra.mrb[84].mxu0 %vm1646_vm0, %v1766_v30 }
 0x4c2   : > { %v1922_v41 = vpop.f32.mrb[40].mxu1  ;;  %v2035_v57 = vpop.f32.mrb[56].mxu0 }
 0x4c3   : > { %2114 = vst [vmem:[%s3734_s14] sm:$0xff] %v1922_v41  ;;  %2116 = vst [vmem:[%s3734_s14 + $0x10] sm:$0xff] %v2035_v57  ;;  %v1924_v0 = vpop.f32.mrb[41].mxu1  ;;  %v2037_v4 = vpop.f32.mrb[57].mxu0 }
 0x4c4   : > { %2115 = vst [vmem:[%s3734_s14 + $0x8] sm:$0xff] %v1924_v0  ;;  %2117 = vst [vmem:[%s3734_s14 + $0x18] sm:$0xff] %v2037_v4  ;;  %v1926_v45 = vpop.f32.mrb[42].mxu1  ;;  %v2039_v55 = vpop.f32.mrb[58].mxu0 }
 0x4c5   : > { %2118 = vst [vmem:[%s3734_s14 + $0x20] sm:$0xff] %v1926_v45  ;;  %2120 = vst [vmem:[%s3734_s14 + $0x30] sm:$0xff] %v2039_v55  ;;  %v1928_v32 = vpop.f32.mrb[43].mxu1  ;;  %v2041_v56 = vpop.f32.mrb[59].mxu0 }
 0x4c6   : > { %2119 = vst [vmem:[%s3734_s14 + $0x28] sm:$0xff] %v1928_v32  ;;  %2121 = vst [vmem:[%s3734_s14 + $0x38] sm:$0xff] %v2041_v56 }
 0x4ca   : > { %v1932_v49 = vpop.f32.mrb[44].mxu1  ;;  %v2045_v6 = vpop.f32.mrb[60].mxu0 }
 0x4cb   : > { %2122 = vst [vmem:[%s3734_s14 + $0x40] sm:$0xff] %v1932_v49  ;;  %2124 = vst [vmem:[%s3734_s14 + $0x50] sm:$0xff] %v2045_v6  ;;  %v1934_v9 = vpop.f32.mrb[45].mxu1  ;;  %v2047_v3 = vpop.f32.mrb[61].mxu0 }
 0x4cc   : > { %2123 = vst [vmem:[%s3734_s14 + $0x48] sm:$0xff] %v1934_v9  ;;  %2125 = vst [vmem:[%s3734_s14 + $0x58] sm:$0xff] %v2047_v3  ;;  %v1936_v31 = vpop.f32.mrb[46].mxu1  ;;  %v2049_v29 = vpop.f32.mrb[62].mxu0 }
 0x4cd   : > { %2126 = vst [vmem:[%s3734_s14 + $0x60] sm:$0xff] %v1936_v31  ;;  %2128 = vst [vmem:[%s3734_s14 + $0x70] sm:$0xff] %v2049_v29  ;;  %v1938_v7 = vpop.f32.mrb[47].mxu1  ;;  %v2051_v12 = vpop.f32.mrb[63].mxu0 }
 0x4ce   : > { %2127 = vst [vmem:[%s3734_s14 + $0x68] sm:$0xff] %v1938_v7  ;;  %2129 = vst [vmem:[%s3734_s14 + $0x78] sm:$0xff] %v2051_v12 }
 0x4d2   : > { %v1942_v2 = vpop.f32.mrb[48].mxu1  ;;  %v2055_v14 = vpop.f32.mrb[64].mxu0 }
 0x4d3   : > { %2130 = vst [vmem:[%s3734_s14 + $0x80] sm:$0xff] %v1942_v2  ;;  %2132 = vst [vmem:[%s3734_s14 + $0x90] sm:$0xff] %v2055_v14  ;;  %v1944_v43 = vpop.f32.mrb[49].mxu1  ;;  %v2057_v17 = vpop.f32.mrb[65].mxu0 }
 0x4d4   : > { %2131 = vst [vmem:[%s3734_s14 + $0x88] sm:$0xff] %v1944_v43  ;;  %2133 = vst [vmem:[%s3734_s14 + $0x98] sm:$0xff] %v2057_v17  ;;  %v1946_v20 = vpop.f32.mrb[50].mxu1  ;;  %v2059_v23 = vpop.f32.mrb[66].mxu0 }
 0x4d5   : > { %2134 = vst [vmem:[%s3734_s14 + $0xa0] sm:$0xff] %v1946_v20  ;;  %2136 = vst [vmem:[%s3734_s14 + $0xb0] sm:$0xff] %v2059_v23  ;;  %v1948_v15 = vpop.f32.mrb[51].mxu1  ;;  %v2061_v61 = vpop.f32.mrb[67].mxu0 }
 0x4d6   : > { %2135 = vst [vmem:[%s3734_s14 + $0xa8] sm:$0xff] %v1948_v15  ;;  %2137 = vst [vmem:[%s3734_s14 + $0xb8] sm:$0xff] %v2061_v61 }
 0x4da   : > { %v1952_v51 = vpop.f32.mrb[52].mxu1  ;;  %v2065_v59 = vpop.f32.mrb[68].mxu0 }
 0x4db   : > { %2138 = vst [vmem:[%s3734_s14 + $0xc0] sm:$0xff] %v1952_v51  ;;  %2140 = vst [vmem:[%s3734_s14 + $0xd0] sm:$0xff] %v2065_v59  ;;  %v1954_v19 = vpop.f32.mrb[53].mxu1  ;;  %v2067_v25 = vpop.f32.mrb[69].mxu0 }
 0x4dc   : > { %2139 = vst [vmem:[%s3734_s14 + $0xc8] sm:$0xff] %v1954_v19  ;;  %2141 = vst [vmem:[%s3734_s14 + $0xd8] sm:$0xff] %v2067_v25  ;;  %v1956_v13 = vpop.f32.mrb[54].mxu1  ;;  %v2069_v10 = vpop.f32.mrb[70].mxu0 }
 0x4dd   : > { %2142 = vst [vmem:[%s3734_s14 + $0xe0] sm:$0xff] %v1956_v13  ;;  %2144 = vst [vmem:[%s3734_s14 + $0xf0] sm:$0xff] %v2069_v10  ;;  %v1958_v60 = vpop.f32.mrb[55].mxu1  ;;  %v2071_v33 = vpop.f32.mrb[71].mxu0 }
 0x4de   : > { %2143 = vst [vmem:[%s3734_s14 + $0xe8] sm:$0xff] %v1958_v60  ;;  %2145 = vst [vmem:[%s3734_s14 + $0xf8] sm:$0xff] %v2071_v33 }
 0x4e2   : > { %v1962_v27 = vpop.f32.mrb[56].mxu1  ;;  %v2075_v28 = vpop.f32.mrb[72].mxu0 }
 0x4e3   : > { %2146 = vst [vmem:[%s3734_s14 + $0x100] sm:$0xff] %v1962_v27  ;;  %2148 = vst [vmem:[%s3734_s14 + $0x110] sm:$0xff] %v2075_v28  ;;  %v1964_v18 = vpop.f32.mrb[57].mxu1  ;;  %v2077_v21 = vpop.f32.mrb[73].mxu0 }
 0x4e4   : > { %2147 = vst [vmem:[%s3734_s14 + $0x108] sm:$0xff] %v1964_v18  ;;  %2149 = vst [vmem:[%s3734_s14 + $0x118] sm:$0xff] %v2077_v21  ;;  %v1966_v16 = vpop.f32.mrb[58].mxu1  ;;  %v2079_v63 = vpop.f32.mrb[74].mxu0 }
 0x4e5   : > { %2150 = vst [vmem:[%s3734_s14 + $0x120] sm:$0xff] %v1966_v16  ;;  %2152 = vst [vmem:[%s3734_s14 + $0x130] sm:$0xff] %v2079_v63  ;;  %v1968_v46 = vpop.f32.mrb[59].mxu1  ;;  %v2081_v35 = vpop.f32.mrb[75].mxu0 }
 0x4e6   : > { %2151 = vst [vmem:[%s3734_s14 + $0x128] sm:$0xff] %v1968_v46  ;;  %2153 = vst [vmem:[%s3734_s14 + $0x138] sm:$0xff] %v2081_v35 }
 0x4ea   : > { %v1972_v62 = vpop.f32.mrb[60].mxu1  ;;  %v2085_v34 = vpop.f32.mrb[76].mxu0 }
 0x4eb   : > { %2154 = vst [vmem:[%s3734_s14 + $0x140] sm:$0xff] %v1972_v62  ;;  %2156 = vst [vmem:[%s3734_s14 + $0x150] sm:$0xff] %v2085_v34  ;;  %v1974_v37 = vpop.f32.mrb[61].mxu1  ;;  %v2087_v38 = vpop.f32.mrb[77].mxu0 }
 0x4ec   : > { %2155 = vst [vmem:[%s3734_s14 + $0x148] sm:$0xff] %v1974_v37  ;;  %2157 = vst [vmem:[%s3734_s14 + $0x158] sm:$0xff] %v2087_v38  ;;  %v1976_v40 = vpop.f32.mrb[62].mxu1  ;;  %v2089_v44 = vpop.f32.mrb[78].mxu0 }
 0x4ed   : > { %2158 = vst [vmem:[%s3734_s14 + $0x160] sm:$0xff] %v1976_v40  ;;  %2160 = vst [vmem:[%s3734_s14 + $0x170] sm:$0xff] %v2089_v44  ;;  %v1978_v42 = vpop.f32.mrb[63].mxu1  ;;  %v2091_v1 = vpop.f32.mrb[79].mxu0 }
 0x4ee   : > { %2159 = vst [vmem:[%s3734_s14 + $0x168] sm:$0xff] %v1978_v42  ;;  %2161 = vst [vmem:[%s3734_s14 + $0x178] sm:$0xff] %v2091_v1 }
 0x4f2   : > { %v1982_v22 = vpop.f32.mrb[64].mxu1  ;;  %v2095_v24 = vpop.f32.mrb[80].mxu0 }
 0x4f3   : > { %2162 = vst [vmem:[%s3734_s14 + $0x180] sm:$0xff] %v1982_v22  ;;  %2164 = vst [vmem:[%s3734_s14 + $0x190] sm:$0xff] %v2095_v24  ;;  %v1984_v47 = vpop.f32.mrb[65].mxu1  ;;  %v2097_v48 = vpop.f32.mrb[81].mxu0 }
 0x4f4   : > { %2163 = vst [vmem:[%s3734_s14 + $0x188] sm:$0xff] %v1984_v47  ;;  %2165 = vst [vmem:[%s3734_s14 + $0x198] sm:$0xff] %v2097_v48  ;;  %v1986_v58 = vpop.f32.mrb[66].mxu1  ;;  %v2099_v53 = vpop.f32.mrb[82].mxu0 }
 0x4f5   : > { %2166 = vst [vmem:[%s3734_s14 + $0x1a0] sm:$0xff] %v1986_v58  ;;  %2168 = vst [vmem:[%s3734_s14 + $0x1b0] sm:$0xff] %v2099_v53  ;;  %v1988_v26 = vpop.f32.mrb[67].mxu1  ;;  %v2101_v50 = vpop.f32.mrb[83].mxu0 }
 0x4f6   : > { %2167 = vst [vmem:[%s3734_s14 + $0x1a8] sm:$0xff] %v1988_v26  ;;  %2169 = vst [vmem:[%s3734_s14 + $0x1b8] sm:$0xff] %v2101_v50 }
 0x4fa   : > { %v1992_v5 = vpop.f32.mrb[68].mxu1  ;;  %v2105_v8 = vpop.f32.mrb[84].mxu0 }
 0x4fb   : > { %2170 = vst [vmem:[%s3734_s14 + $0x1c0] sm:$0xff] %v1992_v5  ;;  %2172 = vst [vmem:[%s3734_s14 + $0x1d0] sm:$0xff] %v2105_v8  ;;  %v1994_v36 = vpop.f32.mrb[69].mxu1  ;;  %v2107_v54 = vpop.f32.mrb[85].mxu0 }
 0x4fc   : > { %2171 = vst [vmem:[%s3734_s14 + $0x1c8] sm:$0xff] %v1994_v36  ;;  %2173 = vst [vmem:[%s3734_s14 + $0x1d8] sm:$0xff] %v2107_v54  ;;  %v1996_v11 = vpop.f32.mrb[70].mxu1  ;;  %v2109_v52 = vpop.f32.mrb[86].mxu0 }
 0x4fd   : > { %2174 = vst [vmem:[%s3734_s14 + $0x1e0] sm:$0xff] %v1996_v11  ;;  %2176 = vst [vmem:[%s3734_s14 + $0x1f0] sm:$0xff] %v2109_v52  ;;  %v1998_v39 = vpop.f32.mrb[71].mxu1  ;;  %v2111_v30 = vpop.f32.mrb[87].mxu0 }
 0x4fe   : > { %2175 = vst [vmem:[%s3734_s14 + $0x1e8] sm:$0xff] %v1998_v39  ;;  %2177 = vst [vmem:[%s3734_s14 + $0x1f8] sm:$0xff] %v2111_v30 }
 0x4ff   : > { %2978 = shalt.err (!%p2975_p6)
}
 0x500   : > { %s2979_s19 = scalar_lea.hbm %s3799_s26, 8192  ;;  %s2983_s18 = scalar_lea.hbm %s3865_s8, 16384 }
 0x501   : > { %p2980_p7 = scmp.ne.s32.totalorder %s3799_s26, %s2979_s19  ;;  %p2984_p4 = scmp.lt.u32.totalorder %s3799_s26, %s3865_s8 }
 0x502   : > { %p2985_p8 = scmp.lt.u32.totalorder %s2983_s18, %s2979_s19  ;;  %p2987_p1 = scmp.lt.u32.totalorder %s2979_s19, %s3799_s26 }
 0x503   : > { %p2981_p9 = pnand %p2980_p7, %p3889_p10 }
 0x504   : > { %p2986_p13 = por %p2985_p8, %p2984_p4 }
 0x505   : > { %p2982_p12 = pneg %p2981_p9 }
 0x506   : > { %p2988_p11 = por %p2987_p1, %p2986_p13 }
 0x508   : > { %p2989_p0 = pnand %p2988_p11, %p2982_p12 }
 0x50a   : > { %2992 = shalt.err (!%p2989_p0)
}
 0x50b   : > { %s3062_s13 = smov 512   ;;  %s3063_s11 = smov 32  }
 0x50c   : > { %2520 = dma.vmem_to_hbm [thread:$0]  (%p3889_p10), %s3801_s24, 8192, %s3799_s26, %s3811_s30, %s3062_s13, %s3062_s13, %s3063_s11  }
 0x50d PF: > { %s3890_s14 = sld [smem:[#allocation18_spill]]  ;;  %p2542_p2 = scmp.ge.s32.totalorder %s3051_s10, 2 }
 0x50e   : > { %s2210_s16 = sand.u32 1, %s3031_s27  }
 0x50f   : > { %s2211_s9 = scalar_lea.sflag [#allocation7], %s2210_s16 }
 0x513   : > { %p3891_p3 = scmp.ne.s32.totalorder %s3890_s14, 0 }
 0x515   : > { %p2533_p5 = pnand %p2542_p2, %p3891_p3 }
 0x517   : > { %3026 = dma.done.wait (!%p2533_p5), %s2211_s9, 8192  }
 0x518   : > { %3028 = vsyncadd (!%p2533_p5), %s2211_s9, 4294959104  ;;  %s23_s10 = sadd.s32 1, %s3051_s10   ;;  %s3892_s25 = sld [smem:[#allocation15_spill]] }
 0x519   : > { %p20_p6 = scmp.ge.s32.totalorder %s23_s10, 4   ;;  %s3893_s29 = sld [smem:[#allocation19_spill]] }
 0x51a   : > { %s3894_s30 = sld [smem:[#allocation16_spill]]  ;;  %s3895_s9 = sld [smem:[#allocation17_spill]] }
 0x51b   : > { %s3896_s27 = smov %s3035_s28  ;;  %22 = sbr.rel (!%p20_p6) target bundleno = 8 (0x8), region = 105 }
 0x51e   : > { %s3897_s28 = smov %s3892_s25 }
 0x522   :  { %2216 = vsyncpa [#allocation6], 1 }
 0x523   :  { %2218 = vsyncpa [#allocation6 + $0x1], 1 }
 0x524   :  { %2219 = vsyncpa [#allocation9], 1 }
 0x525   :  { %2220 = vsyncpa [#allocation7], 1 }
 0x526   :  { %2222 = vsyncpa [#allocation7 + $0x1], 1 }

</bundles_post_ra>
